<compile_context>
chip_gen: v7x
topology: tpu7x:2x2x1
jax: 0.10.0
libtpu: 0.0.40
codegen_flags: <defaults>
</compile_context>

<pallas_src>
import functools
import math

import jax
import jax.numpy as jnp
import numpy as np
from jax.experimental import pallas as pl
from jax.experimental.pallas import tpu as pltpu


def _round_up(x, m):
    return ((x + m - 1) // m) * m


# ----------------------------------------------------------------------------
# Pallas kernel: full MLP (with skip) for one batch tile.
# The layer structure (D, skips) is static -> plain Python loop at trace time.
# ----------------------------------------------------------------------------
def _make_kernel(D, skips):
    skips = tuple(skips)

    def kernel(*refs):
        x_ref = refs[0]
        out_ref = refs[-1]
        params = refs[1:-1]

        x = x_ref[...]                      # (TB, Cin) f32
        h = x
        p = 0
        for i in range(D):
            if i in skips:
                # cat([x, h], -1) @ W  ==  x @ W[:Cin] + h @ W[Cin:]
                wx, wh, b = params[p], params[p + 1], params[p + 2]
                p += 3
                z = (jnp.dot(x, wx[...], preferred_element_type=jnp.float32)
                     + jnp.dot(h, wh[...], preferred_element_type=jnp.float32)
                     + b[...])
            else:
                w, b = params[p], params[p + 1]
                p += 2
                z = jnp.dot(h, w[...], preferred_element_type=jnp.float32) + b[...]
            h = jnp.maximum(z, 0.0)         # nn.ReLU(True)

        wf, bf = params[p], params[p + 1]   # linear_final (no activation)
        out_ref[...] = (jnp.dot(h, wf[...], preferred_element_type=jnp.float32)
                        + bf[...]).astype(out_ref.dtype)

    return kernel


# ----------------------------------------------------------------------------
# Module wrapper
# ----------------------------------------------------------------------------
class NeRFFeatPallas:
    """NeRFFeat forward pass (== BaseMLP forward) on TPU via Pallas."""

    def __init__(self, D=8, W=256, in_channels=63, out_channels=3,
                 skips=(4,), key=None, max_block_rows=512):
        self.D = int(D)
        self.W = int(W)
        self.in_channels = int(in_channels)
        self.out_channels = int(out_channels)
        self.skips = tuple(skips)
        self.max_block_rows = int(max_block_rows)

        if key is None:
            key = jax.random.PRNGKey(0)

        # nn.Linear-style init: U(-1/sqrt(fan_in), 1/sqrt(fan_in)) for W and b.
        # Weights stored in (in_features, out_features) layout so the kernel
        # computes h @ W directly (no transpose inside the kernel).
        self.Ws = []      # unsplit weights, for the pure-JAX reference
        self.bs_ = []
        keys = jax.random.split(key, 2 * (self.D + 1))
        for i in range(self.D):
            if i == 0:
                fin = self.in_channels
            elif i in self.skips:
                fin = self.in_channels + self.W
            else:
                fin = self.W
            bound = 1.0 / math.sqrt(fin)
            Wi = jax.random.uniform(keys[2 * i], (fin, self.W),
                                    jnp.float32, -bound, bound)
            bi = jax.random.uniform(keys[2 * i + 1], (self.W,),
                                    jnp.float32, -bound, bound)
            self.Ws.append(Wi)
            self.bs_.append(bi)
        bound = 1.0 / math.sqrt(self.W)
        self.Wf = jax.random.uniform(keys[-2], (self.W, self.out_channels),
                                     jnp.float32, -bound, bound)
        self.bf = jax.random.uniform(keys[-1], (self.out_channels,),
                                     jnp.float32, -bound, bound)

        # Flat parameter list the kernel consumes (skip weight pre-split so the
        # kernel never concatenates an odd lane width).  Order follows the
        # PyTorch concat order torch.cat([x, out], -1): x rows first.
        flat = []
        for i in range(self.D):
            if i in self.skips:
                flat.append(self.Ws[i][:self.in_channels])   # (Cin, W)
                flat.append(self.Ws[i][self.in_channels:])   # (W,   W)
            else:
                flat.append(self.Ws[i])                      # (fin, W)
            flat.append(self.bs_[i].reshape(1, self.W))      # (1,   W)
        flat.append(self.Wf)                                 # (W, Cout)
        flat.append(self.bf.reshape(1, self.out_channels))   # (1, Cout)
        self._flat = flat

        self._kernel = _make_kernel(self.D, self.skips)

    def __call__(self, x):
        x = x.astype(jnp.float32)
        bs = x.shape[0]
        cin = self.in_channels
        # Batch tile: multiple of 8 sublanes, capped so VMEM stays small.
        tb = min(self.max_block_rows, _round_up(bs, 8))
        grid = (pl.cdiv(bs, tb),)

        in_specs = [pl.BlockSpec((tb, cin), lambda i: (i, 0))]
        # Constant index_map -> weights/biases stay resident in VMEM.
        in_specs += [pl.BlockSpec(p.shape, lambda i: (0, 0)) for p in self._flat]
        out_specs = pl.BlockSpec((tb, self.out_channels), lambda i: (i, 0))

        return pl.pallas_call(
            self._kernel,
            out_shape=jax.ShapeDtypeStruct((bs, self.out_channels), jnp.float32),
            grid=grid,
            in_specs=in_specs,
            out_specs=out_specs,
            compiler_params=pltpu.CompilerParams(
                dimension_semantics=("parallel",)),
        )(x, *self._flat)

    # Pure-JAX reference mirroring the PyTorch forward exactly
    # (uses the UNSPLIT skip weight, independently validating the split trick).
    def reference(self, x):
        x = x.astype(jnp.float32)
        hp = jax.lax.Precision.HIGHEST
        h = x
        for i in range(self.D):
            if i in self.skips:
                h = jnp.concatenate([x, h], -1)
            h = jnp.maximum(jnp.dot(h, self.Ws[i], precision=hp) + self.bs_[i], 0.0)
        return jnp.dot(h, self.Wf, precision=hp) + self.bf


if __name__ == "__main__":
    key = jax.random.PRNGKey(0)
    k_params, k_x = jax.random.split(key)

    # Module defaults: D=8, W=256, in_channels=63, out_channels=3, skips=[4].
    model = NeRFFeatPallas(D=8, W=256, in_channels=63, out_channels=3,
                           skips=(4,), key=k_params)

    bs = 16
    x = jax.random.normal(k_x, (bs, 63), jnp.float32)

    out = model(x)
    out = jax.block_until_ready(out)

    ref = model.reference(x)
    assert out.shape == (bs, 3)
    np.testing.assert_allclose(np.asarray(out), np.asarray(ref),
                               rtol=1e-3, atol=1e-3)

    print("KERNEL_OK")
</pallas_src>

<mosaic_0001>
module attributes {stable_mosaic.version = 11 : i64} {
  func.func @kernel(%arg0: i32, %arg1: memref<16x63xf32, #tpu.memory_space<vmem>>, %arg2: memref<63x256xf32, #tpu.memory_space<vmem>>, %arg3: memref<1x256xf32, #tpu.memory_space<vmem>>, %arg4: memref<256x256xf32, #tpu.memory_space<vmem>>, %arg5: memref<1x256xf32, #tpu.memory_space<vmem>>, %arg6: memref<256x256xf32, #tpu.memory_space<vmem>>, %arg7: memref<1x256xf32, #tpu.memory_space<vmem>>, %arg8: memref<256x256xf32, #tpu.memory_space<vmem>>, %arg9: memref<1x256xf32, #tpu.memory_space<vmem>>, %arg10: memref<63x256xf32, #tpu.memory_space<vmem>>, %arg11: memref<256x256xf32, #tpu.memory_space<vmem>>, %arg12: memref<1x256xf32, #tpu.memory_space<vmem>>, %arg13: memref<256x256xf32, #tpu.memory_space<vmem>>, %arg14: memref<1x256xf32, #tpu.memory_space<vmem>>, %arg15: memref<256x256xf32, #tpu.memory_space<vmem>>, %arg16: memref<1x256xf32, #tpu.memory_space<vmem>>, %arg17: memref<256x256xf32, #tpu.memory_space<vmem>>, %arg18: memref<1x256xf32, #tpu.memory_space<vmem>>, %arg19: memref<256x3xf32, #tpu.memory_space<vmem>>, %arg20: memref<1x3xf32, #tpu.memory_space<vmem>>, %arg21: memref<16x3xf32, #tpu.memory_space<vmem>>) attributes {dimension_semantics = [#tpu.dimension_semantics<parallel>], iteration_bounds = array<i64: 1>, scalar_prefetch = 0 : i64, scratch_operands = 0 : i64, tpu.core_type = #tpu.core_type<tc>, window_params = [{transform_indices = @transform_0, window_bounds = array<i64: 16, 63>}, {pipeline_mode = #tpu.pipeline_mode<synchronous>, transform_indices = @transform_1, window_bounds = array<i64: 63, 256>}, {pipeline_mode = #tpu.pipeline_mode<synchronous>, transform_indices = @transform_2, window_bounds = array<i64: 1, 256>}, {pipeline_mode = #tpu.pipeline_mode<synchronous>, transform_indices = @transform_3, window_bounds = array<i64: 256, 256>}, {pipeline_mode = #tpu.pipeline_mode<synchronous>, transform_indices = @transform_4, window_bounds = array<i64: 1, 256>}, {pipeline_mode = #tpu.pipeline_mode<synchronous>, transform_indices = @transform_5, window_bounds = array<i64: 256, 256>}, {pipeline_mode = #tpu.pipeline_mode<synchronous>, transform_indices = @transform_6, window_bounds = array<i64: 1, 256>}, {pipeline_mode = #tpu.pipeline_mode<synchronous>, transform_indices = @transform_7, window_bounds = array<i64: 256, 256>}, {pipeline_mode = #tpu.pipeline_mode<synchronous>, transform_indices = @transform_8, window_bounds = array<i64: 1, 256>}, {pipeline_mode = #tpu.pipeline_mode<synchronous>, transform_indices = @transform_9, window_bounds = array<i64: 63, 256>}, {pipeline_mode = #tpu.pipeline_mode<synchronous>, transform_indices = @transform_10, window_bounds = array<i64: 256, 256>}, {pipeline_mode = #tpu.pipeline_mode<synchronous>, transform_indices = @transform_11, window_bounds = array<i64: 1, 256>}, {pipeline_mode = #tpu.pipeline_mode<synchronous>, transform_indices = @transform_12, window_bounds = array<i64: 256, 256>}, {pipeline_mode = #tpu.pipeline_mode<synchronous>, transform_indices = @transform_13, window_bounds = array<i64: 1, 256>}, {pipeline_mode = #tpu.pipeline_mode<synchronous>, transform_indices = @transform_14, window_bounds = array<i64: 256, 256>}, {pipeline_mode = #tpu.pipeline_mode<synchronous>, transform_indices = @transform_15, window_bounds = array<i64: 1, 256>}, {pipeline_mode = #tpu.pipeline_mode<synchronous>, transform_indices = @transform_16, window_bounds = array<i64: 256, 256>}, {pipeline_mode = #tpu.pipeline_mode<synchronous>, transform_indices = @transform_17, window_bounds = array<i64: 1, 256>}, {pipeline_mode = #tpu.pipeline_mode<synchronous>, transform_indices = @transform_18, window_bounds = array<i64: 256, 3>}, {pipeline_mode = #tpu.pipeline_mode<synchronous>, transform_indices = @transform_19, window_bounds = array<i64: 1, 3>}, {transform_indices = @transform_20, window_bounds = array<i64: 16, 3>}]} {
    %c0 = arith.constant 0 : index
    %c0_0 = arith.constant 0 : index
    %0 = vector.load %arg1[%c0, %c0_0] : memref<16x63xf32, #tpu.memory_space<vmem>>, vector<16x63xf32>
    %c0_1 = arith.constant 0 : index
    %c0_2 = arith.constant 0 : index
    %1 = vector.load %arg2[%c0_1, %c0_2] : memref<63x256xf32, #tpu.memory_space<vmem>>, vector<63x256xf32>
    %cst = arith.constant dense<0.000000e+00> : vector<16x256xf32>
    %2 = tpu.matmul %0, %1, %cst {dimension_numbers = #tpu.dot_dimension_numbers<[1], [0], [0], [1], [0, 0, 1, 1], [], []>} : vector<16x63xf32>, vector<63x256xf32>, vector<16x256xf32> -> vector<16x256xf32>
    %c0_3 = arith.constant 0 : index
    %c0_4 = arith.constant 0 : index
    %3 = vector.load %arg3[%c0_3, %c0_4] : memref<1x256xf32, #tpu.memory_space<vmem>>, vector<1x256xf32>
    %4 = vector.broadcast %3 : vector<1x256xf32> to vector<16x256xf32>
    %5 = arith.addf %2, %4 : vector<16x256xf32>
    %cst_5 = arith.constant 0.000000e+00 : f32
    %6 = vector.broadcast %cst_5 : f32 to vector<16x256xf32>
    %7 = arith.maximumf %5, %6 : vector<16x256xf32>
    %c0_6 = arith.constant 0 : index
    %c0_7 = arith.constant 0 : index
    %8 = vector.load %arg4[%c0_6, %c0_7] : memref<256x256xf32, #tpu.memory_space<vmem>>, vector<256x256xf32>
    %cst_8 = arith.constant dense<0.000000e+00> : vector<16x256xf32>
    %9 = tpu.matmul %7, %8, %cst_8 {dimension_numbers = #tpu.dot_dimension_numbers<[1], [0], [0], [1], [0, 0, 1, 1], [], []>} : vector<16x256xf32>, vector<256x256xf32>, vector<16x256xf32> -> vector<16x256xf32>
    %c0_9 = arith.constant 0 : index
    %c0_10 = arith.constant 0 : index
    %10 = vector.load %arg5[%c0_9, %c0_10] : memref<1x256xf32, #tpu.memory_space<vmem>>, vector<1x256xf32>
    %11 = vector.broadcast %10 : vector<1x256xf32> to vector<16x256xf32>
    %12 = arith.addf %9, %11 : vector<16x256xf32>
    %cst_11 = arith.constant 0.000000e+00 : f32
    %13 = vector.broadcast %cst_11 : f32 to vector<16x256xf32>
    %14 = arith.maximumf %12, %13 : vector<16x256xf32>
    %c0_12 = arith.constant 0 : index
    %c0_13 = arith.constant 0 : index
    %15 = vector.load %arg6[%c0_12, %c0_13] : memref<256x256xf32, #tpu.memory_space<vmem>>, vector<256x256xf32>
    %cst_14 = arith.constant dense<0.000000e+00> : vector<16x256xf32>
    %16 = tpu.matmul %14, %15, %cst_14 {dimension_numbers = #tpu.dot_dimension_numbers<[1], [0], [0], [1], [0, 0, 1, 1], [], []>} : vector<16x256xf32>, vector<256x256xf32>, vector<16x256xf32> -> vector<16x256xf32>
    %c0_15 = arith.constant 0 : index
    %c0_16 = arith.constant 0 : index
    %17 = vector.load %arg7[%c0_15, %c0_16] : memref<1x256xf32, #tpu.memory_space<vmem>>, vector<1x256xf32>
    %18 = vector.broadcast %17 : vector<1x256xf32> to vector<16x256xf32>
    %19 = arith.addf %16, %18 : vector<16x256xf32>
    %cst_17 = arith.constant 0.000000e+00 : f32
    %20 = vector.broadcast %cst_17 : f32 to vector<16x256xf32>
    %21 = arith.maximumf %19, %20 : vector<16x256xf32>
    %c0_18 = arith.constant 0 : index
    %c0_19 = arith.constant 0 : index
    %22 = vector.load %arg8[%c0_18, %c0_19] : memref<256x256xf32, #tpu.memory_space<vmem>>, vector<256x256xf32>
    %cst_20 = arith.constant dense<0.000000e+00> : vector<16x256xf32>
    %23 = tpu.matmul %21, %22, %cst_20 {dimension_numbers = #tpu.dot_dimension_numbers<[1], [0], [0], [1], [0, 0, 1, 1], [], []>} : vector<16x256xf32>, vector<256x256xf32>, vector<16x256xf32> -> vector<16x256xf32>
    %c0_21 = arith.constant 0 : index
    %c0_22 = arith.constant 0 : index
    %24 = vector.load %arg9[%c0_21, %c0_22] : memref<1x256xf32, #tpu.memory_space<vmem>>, vector<1x256xf32>
    %25 = vector.broadcast %24 : vector<1x256xf32> to vector<16x256xf32>
    %26 = arith.addf %23, %25 : vector<16x256xf32>
    %cst_23 = arith.constant 0.000000e+00 : f32
    %27 = vector.broadcast %cst_23 : f32 to vector<16x256xf32>
    %28 = arith.maximumf %26, %27 : vector<16x256xf32>
    %c0_24 = arith.constant 0 : index
    %c0_25 = arith.constant 0 : index
    %29 = vector.load %arg10[%c0_24, %c0_25] : memref<63x256xf32, #tpu.memory_space<vmem>>, vector<63x256xf32>
    %cst_26 = arith.constant dense<0.000000e+00> : vector<16x256xf32>
    %30 = tpu.matmul %0, %29, %cst_26 {dimension_numbers = #tpu.dot_dimension_numbers<[1], [0], [0], [1], [0, 0, 1, 1], [], []>} : vector<16x63xf32>, vector<63x256xf32>, vector<16x256xf32> -> vector<16x256xf32>
    %c0_27 = arith.constant 0 : index
    %c0_28 = arith.constant 0 : index
    %31 = vector.load %arg11[%c0_27, %c0_28] : memref<256x256xf32, #tpu.memory_space<vmem>>, vector<256x256xf32>
    %cst_29 = arith.constant dense<0.000000e+00> : vector<16x256xf32>
    %32 = tpu.matmul %28, %31, %cst_29 {dimension_numbers = #tpu.dot_dimension_numbers<[1], [0], [0], [1], [0, 0, 1, 1], [], []>} : vector<16x256xf32>, vector<256x256xf32>, vector<16x256xf32> -> vector<16x256xf32>
    %33 = arith.addf %30, %32 : vector<16x256xf32>
    %c0_30 = arith.constant 0 : index
    %c0_31 = arith.constant 0 : index
    %34 = vector.load %arg12[%c0_30, %c0_31] : memref<1x256xf32, #tpu.memory_space<vmem>>, vector<1x256xf32>
    %35 = vector.broadcast %34 : vector<1x256xf32> to vector<16x256xf32>
    %36 = arith.addf %33, %35 : vector<16x256xf32>
    %cst_32 = arith.constant 0.000000e+00 : f32
    %37 = vector.broadcast %cst_32 : f32 to vector<16x256xf32>
    %38 = arith.maximumf %36, %37 : vector<16x256xf32>
    %c0_33 = arith.constant 0 : index
    %c0_34 = arith.constant 0 : index
    %39 = vector.load %arg13[%c0_33, %c0_34] : memref<256x256xf32, #tpu.memory_space<vmem>>, vector<256x256xf32>
    %cst_35 = arith.constant dense<0.000000e+00> : vector<16x256xf32>
    %40 = tpu.matmul %38, %39, %cst_35 {dimension_numbers = #tpu.dot_dimension_numbers<[1], [0], [0], [1], [0, 0, 1, 1], [], []>} : vector<16x256xf32>, vector<256x256xf32>, vector<16x256xf32> -> vector<16x256xf32>
    %c0_36 = arith.constant 0 : index
    %c0_37 = arith.constant 0 : index
    %41 = vector.load %arg14[%c0_36, %c0_37] : memref<1x256xf32, #tpu.memory_space<vmem>>, vector<1x256xf32>
    %42 = vector.broadcast %41 : vector<1x256xf32> to vector<16x256xf32>
    %43 = arith.addf %40, %42 : vector<16x256xf32>
    %cst_38 = arith.constant 0.000000e+00 : f32
    %44 = vector.broadcast %cst_38 : f32 to vector<16x256xf32>
    %45 = arith.maximumf %43, %44 : vector<16x256xf32>
    %c0_39 = arith.constant 0 : index
    %c0_40 = arith.constant 0 : index
    %46 = vector.load %arg15[%c0_39, %c0_40] : memref<256x256xf32, #tpu.memory_space<vmem>>, vector<256x256xf32>
    %cst_41 = arith.constant dense<0.000000e+00> : vector<16x256xf32>
    %47 = tpu.matmul %45, %46, %cst_41 {dimension_numbers = #tpu.dot_dimension_numbers<[1], [0], [0], [1], [0, 0, 1, 1], [], []>} : vector<16x256xf32>, vector<256x256xf32>, vector<16x256xf32> -> vector<16x256xf32>
    %c0_42 = arith.constant 0 : index
    %c0_43 = arith.constant 0 : index
    %48 = vector.load %arg16[%c0_42, %c0_43] : memref<1x256xf32, #tpu.memory_space<vmem>>, vector<1x256xf32>
    %49 = vector.broadcast %48 : vector<1x256xf32> to vector<16x256xf32>
    %50 = arith.addf %47, %49 : vector<16x256xf32>
    %cst_44 = arith.constant 0.000000e+00 : f32
    %51 = vector.broadcast %cst_44 : f32 to vector<16x256xf32>
    %52 = arith.maximumf %50, %51 : vector<16x256xf32>
    %c0_45 = arith.constant 0 : index
    %c0_46 = arith.constant 0 : index
    %53 = vector.load %arg17[%c0_45, %c0_46] : memref<256x256xf32, #tpu.memory_space<vmem>>, vector<256x256xf32>
    %cst_47 = arith.constant dense<0.000000e+00> : vector<16x256xf32>
    %54 = tpu.matmul %52, %53, %cst_47 {dimension_numbers = #tpu.dot_dimension_numbers<[1], [0], [0], [1], [0, 0, 1, 1], [], []>} : vector<16x256xf32>, vector<256x256xf32>, vector<16x256xf32> -> vector<16x256xf32>
    %c0_48 = arith.constant 0 : index
    %c0_49 = arith.constant 0 : index
    %55 = vector.load %arg18[%c0_48, %c0_49] : memref<1x256xf32, #tpu.memory_space<vmem>>, vector<1x256xf32>
    %56 = vector.broadcast %55 : vector<1x256xf32> to vector<16x256xf32>
    %57 = arith.addf %54, %56 : vector<16x256xf32>
    %cst_50 = arith.constant 0.000000e+00 : f32
    %58 = vector.broadcast %cst_50 : f32 to vector<16x256xf32>
    %59 = arith.maximumf %57, %58 : vector<16x256xf32>
    %c0_51 = arith.constant 0 : index
    %c0_52 = arith.constant 0 : index
    %60 = vector.load %arg19[%c0_51, %c0_52] : memref<256x3xf32, #tpu.memory_space<vmem>>, vector<256x3xf32>
    %cst_53 = arith.constant dense<0.000000e+00> : vector<16x3xf32>
    %61 = tpu.matmul %59, %60, %cst_53 {dimension_numbers = #tpu.dot_dimension_numbers<[1], [0], [0], [1], [0, 0, 1, 1], [], []>} : vector<16x256xf32>, vector<256x3xf32>, vector<16x3xf32> -> vector<16x3xf32>
    %c0_54 = arith.constant 0 : index
    %c0_55 = arith.constant 0 : index
    %62 = vector.load %arg20[%c0_54, %c0_55] : memref<1x3xf32, #tpu.memory_space<vmem>>, vector<1x3xf32>
    %63 = vector.broadcast %62 : vector<1x3xf32> to vector<16x3xf32>
    %64 = arith.addf %61, %63 : vector<16x3xf32>
    %c0_56 = arith.constant 0 : index
    %c0_57 = arith.constant 0 : index
    %65 = vector.load %arg21[%c0_56, %c0_57] : memref<16x3xf32, #tpu.memory_space<vmem>>, vector<16x3xf32>
    tpu.vector_store %arg21[%c0_56, %c0_57], %64 {strides = array<i32>} : memref<16x3xf32, #tpu.memory_space<vmem>>, vector<16x3xf32>,
    return
  }
  func.func @transform_0(%arg0: i32) -> (i32, i32) {
    %c0_i32 = arith.constant 0 : i32
    %c0_i32_0 = arith.constant 0 : i32
    return %arg0, %c0_i32 : i32, i32
  }
  func.func @transform_1(%arg0: i32) -> (i32, i32) {
    %c0_i32 = arith.constant 0 : i32
    %c0_i32_0 = arith.constant 0 : i32
    %c0_i32_1 = arith.constant 0 : i32
    return %c0_i32, %c0_i32_0 : i32, i32
  }
  func.func @transform_2(%arg0: i32) -> (i32, i32) {
    %c0_i32 = arith.constant 0 : i32
    %c0_i32_0 = arith.constant 0 : i32
    %c0_i32_1 = arith.constant 0 : i32
    return %c0_i32, %c0_i32_0 : i32, i32
  }
  func.func @transform_3(%arg0: i32) -> (i32, i32) {
    %c0_i32 = arith.constant 0 : i32
    %c0_i32_0 = arith.constant 0 : i32
    %c0_i32_1 = arith.constant 0 : i32
    return %c0_i32, %c0_i32_0 : i32, i32
  }
  func.func @transform_4(%arg0: i32) -> (i32, i32) {
    %c0_i32 = arith.constant 0 : i32
    %c0_i32_0 = arith.constant 0 : i32
    %c0_i32_1 = arith.constant 0 : i32
    return %c0_i32, %c0_i32_0 : i32, i32
  }
  func.func @transform_5(%arg0: i32) -> (i32, i32) {
    %c0_i32 = arith.constant 0 : i32
    %c0_i32_0 = arith.constant 0 : i32
    %c0_i32_1 = arith.constant 0 : i32
    return %c0_i32, %c0_i32_0 : i32, i32
  }
  func.func @transform_6(%arg0: i32) -> (i32, i32) {
    %c0_i32 = arith.constant 0 : i32
    %c0_i32_0 = arith.constant 0 : i32
    %c0_i32_1 = arith.constant 0 : i32
    return %c0_i32, %c0_i32_0 : i32, i32
  }
  func.func @transform_7(%arg0: i32) -> (i32, i32) {
    %c0_i32 = arith.constant 0 : i32
    %c0_i32_0 = arith.constant 0 : i32
    %c0_i32_1 = arith.constant 0 : i32
    return %c0_i32, %c0_i32_0 : i32, i32
  }
  func.func @transform_8(%arg0: i32) -> (i32, i32) {
    %c0_i32 = arith.constant 0 : i32
    %c0_i32_0 = arith.constant 0 : i32
    %c0_i32_1 = arith.constant 0 : i32
    return %c0_i32, %c0_i32_0 : i32, i32
  }
  func.func @transform_9(%arg0: i32) -> (i32, i32) {
    %c0_i32 = arith.constant 0 : i32
    %c0_i32_0 = arith.constant 0 : i32
    %c0_i32_1 = arith.constant 0 : i32
    return %c0_i32, %c0_i32_0 : i32, i32
  }
  func.func @transform_10(%arg0: i32) -> (i32, i32) {
    %c0_i32 = arith.constant 0 : i32
    %c0_i32_0 = arith.constant 0 : i32
    %c0_i32_1 = arith.constant 0 : i32
    return %c0_i32, %c0_i32_0 : i32, i32
  }
  func.func @transform_11(%arg0: i32) -> (i32, i32) {
    %c0_i32 = arith.constant 0 : i32
    %c0_i32_0 = arith.constant 0 : i32
    %c0_i32_1 = arith.constant 0 : i32
    return %c0_i32, %c0_i32_0 : i32, i32
  }
  func.func @transform_12(%arg0: i32) -> (i32, i32) {
    %c0_i32 = arith.constant 0 : i32
    %c0_i32_0 = arith.constant 0 : i32
    %c0_i32_1 = arith.constant 0 : i32
    return %c0_i32, %c0_i32_0 : i32, i32
  }
  func.func @transform_13(%arg0: i32) -> (i32, i32) {
    %c0_i32 = arith.constant 0 : i32
    %c0_i32_0 = arith.constant 0 : i32
    %c0_i32_1 = arith.constant 0 : i32
    return %c0_i32, %c0_i32_0 : i32, i32
  }
  func.func @transform_14(%arg0: i32) -> (i32, i32) {
    %c0_i32 = arith.constant 0 : i32
    %c0_i32_0 = arith.constant 0 : i32
    %c0_i32_1 = arith.constant 0 : i32
    return %c0_i32, %c0_i32_0 : i32, i32
  }
  func.func @transform_15(%arg0: i32) -> (i32, i32) {
    %c0_i32 = arith.constant 0 : i32
    %c0_i32_0 = arith.constant 0 : i32
    %c0_i32_1 = arith.constant 0 : i32
    return %c0_i32, %c0_i32_0 : i32, i32
  }
  func.func @transform_16(%arg0: i32) -> (i32, i32) {
    %c0_i32 = arith.constant 0 : i32
    %c0_i32_0 = arith.constant 0 : i32
    %c0_i32_1 = arith.constant 0 : i32
    return %c0_i32, %c0_i32_0 : i32, i32
  }
  func.func @transform_17(%arg0: i32) -> (i32, i32) {
    %c0_i32 = arith.constant 0 : i32
    %c0_i32_0 = arith.constant 0 : i32
    %c0_i32_1 = arith.constant 0 : i32
    return %c0_i32, %c0_i32_0 : i32, i32
  }
  func.func @transform_18(%arg0: i32) -> (i32, i32) {
    %c0_i32 = arith.constant 0 : i32
    %c0_i32_0 = arith.constant 0 : i32
    %c0_i32_1 = arith.constant 0 : i32
    return %c0_i32, %c0_i32_0 : i32, i32
  }
  func.func @transform_19(%arg0: i32) -> (i32, i32) {
    %c0_i32 = arith.constant 0 : i32
    %c0_i32_0 = arith.constant 0 : i32
    %c0_i32_1 = arith.constant 0 : i32
    return %c0_i32, %c0_i32_0 : i32, i32
  }
  func.func @transform_20(%arg0: i32) -> (i32, i32) {
    %c0_i32 = arith.constant 0 : i32
    %c0_i32_0 = arith.constant 0 : i32
    return %arg0, %c0_i32 : i32, i32
  }
}

</mosaic_0001>

<bundles_post_ra>
// kernel: tpu_custom_call.1
= control target key start
LH: loop header
LB: loop body
LE: loop exit
PB: predicated region body
PF: predicated region fallthrough
CT: control target
= control target key end

     0   :  { %s2912_s0 = inlined_call_operand.hbm [shape: f32[16,63], index: 0, kind: input, shape index: {}]   ;;  %s2913_s1 = inlined_call_operand.vmem [shape: f32[63,256], index: 1, kind: input, shape index: {}]   ;;  %s2914_s2 = inlined_call_operand.vmem [shape: f32[1,256], index: 2, kind: input, shape index: {}]   ;;  %s2915_s3 = inlined_call_operand.hbm [shape: f32[256,256], index: 3, kind: input, shape index: {}]   ;;  %s2916_s4 = inlined_call_operand.vmem [shape: f32[1,256], index: 4, kind: input, shape index: {}]   ;;  %s2917_s5 = inlined_call_operand.hbm [shape: f32[256,256], index: 5, kind: input, shape index: {}]   ;;  %s2918_s6 = inlined_call_operand.vmem [shape: f32[1,256], index: 6, kind: input, shape index: {}]   ;;  %s2919_s7 = inlined_call_operand.hbm [shape: f32[256,256], index: 7, kind: input, shape index: {}]   ;;  %s2920_s8 = inlined_call_operand.vmem [shape: f32[1,256], index: 8, kind: input, shape index: {}]   ;;  %s2921_s9 = inlined_call_operand.vmem [shape: f32[63,256], index: 9, kind: input, shape index: {}]   ;;  %s2922_s10 = inlined_call_operand.hbm [shape: f32[256,256], index: 10, kind: input, shape index: {}]   ;;  %s2923_s11 = inlined_call_operand.vmem [shape: f32[1,256], index: 11, kind: input, shape index: {}]   ;;  %s2924_s12 = inlined_call_operand.hbm [shape: f32[256,256], index: 12, kind: input, shape index: {}]   ;;  %s2925_s13 = inlined_call_operand.vmem [shape: f32[1,256], index: 13, kind: input, shape index: {}]   ;;  %s2926_s14 = inlined_call_operand.hbm [shape: f32[256,256], index: 14, kind: input, shape index: {}]   ;;  %s2927_s15 = inlined_call_operand.vmem [shape: f32[1,256], index: 15, kind: input, shape index: {}]   ;;  %s2928_s16 = inlined_call_operand.hbm [shape: f32[256,256], index: 16, kind: input, shape index: {}]   ;;  %s2929_s17 = inlined_call_operand.vmem [shape: f32[1,256], index: 17, kind: input, shape index: {}]   ;;  %s2930_s18 = inlined_call_operand.vmem [shape: f32[256,3], index: 18, kind: input, shape index: {}]   ;;  %s2931_s19 = inlined_call_operand.vmem [shape: f32[1,3], index: 19, kind: input, shape index: {}]   ;;  %s2932_s20 = inlined_call_operand.vmem [shape: f32[16,3], index: 20, kind: output, shape index: {}]  }
   0x1   :  { %2937 = sst [smem:[#allocation20_spill]] %s2912_s0 }
   0x2   :  { %2938 = sst [smem:[#allocation21_spill]] %s2913_s1 }
   0x3   :  { %2939 = sst [smem:[#allocation22_spill]] %s2914_s2 }
   0x4   :  { %2940 = sst [smem:[#allocation23_spill]] %s2915_s3 }
   0x5   :  { %2941 = sst [smem:[#allocation24_spill]] %s2916_s4 }
   0x6   :  { %2942 = sst [smem:[#allocation25_spill]] %s2931_s19 }
   0x7   :  { %2943 = sst [smem:[#allocation26_spill]] %s2932_s20 }
   0x8   :  { %25 = vsyncpa [#allocation3], 0 }
   0x9   :  { %26 = vsyncpa [#allocation5], 0 }
   0xa   :  { %27 = vsyncpa [#allocation8], 0 }
   0xb   :  { %28 = vsyncpa [#allocation11], 0 }
   0xc   :  { %29 = vsyncpa [#allocation14], 0  ;;  %s2396_s1 = smov [#allocation4]   ;;  %s2944_s2 = sld [smem:[#allocation23_spill]] }
   0xd   :  { %s51_s22 = sshll.u32 %s2396_s1, 4  ;;  %s52_s22 = int_to_ptr.vmem [resolvable:$true] %s51_s22 }
  0x12   :  { %s2210_s25 = scalar_lea.hbm %s2944_s2, 8192 }
  0x13   :  { %p2211_p0 = scmp.ne.s32.totalorder %s2944_s2, %s2210_s25  ;;  %p2214_p1 = scmp.lt.u32.totalorder %s2210_s25, %s2944_s2 }
  0x15   :  { %p2216_p2 = pnand %p2214_p1, %p2211_p0 }
  0x17   :  { %2219 = shalt.err (!%p2216_p2)
}
  0x18   :  { %s2220_s4 = scalar_lea.vmem %s52_s22, 8192  ;;  %p2225_p4 = scmp.lt.s32.totalorder %s52_s22, %s52_s22 }
  0x19   :  { %p2221_p3 = scmp.ne.s32.totalorder %s52_s22, %s2220_s4  ;;  %p2226_p5 = scmp.lt.s32.totalorder %s2220_s4, %s2220_s4 }
  0x1b   :  { %p2227_p6 = por %p2226_p5, %p2225_p4 }
  0x1d   :  { %p2228_p7 = pnand %p2227_p6, %p2221_p3 }
  0x1f   :  { %2231 = shalt.err (!%p2228_p7)
}
  0x20   :  { %s2397_s29 = smov 256   ;;  %s2398_s30 = smov 16  }
  0x21   :  { %57 = dma.hbm_to_vmem [thread:$0]  %s2944_s2, 8192, %s52_s22, [#allocation5], %s2397_s29, %s2397_s29, %s2398_s30  }
  0x22   :  { %s2399_s1 = smov [#allocation7]   ;;  %s2400_s24 = smov [#allocation10]  }
  0x23   :  { %s79_s23 = sshll.u32 %s2399_s1, 4  ;;  %s109_s25 = sshll.u32 %s2400_s24, 4  ;;  %s80_s23 = int_to_ptr.vmem [resolvable:$true] %s79_s23  ;;  %s110_s25 = int_to_ptr.vmem [resolvable:$true] %s109_s25 }
  0x24   :  { %s2232_s27 = scalar_lea.hbm %s2919_s7, 8192 }
  0x25   :  { %p2233_p8 = scmp.ne.s32.totalorder %s2919_s7, %s2232_s27  ;;  %p2236_p9 = scmp.lt.u32.totalorder %s2232_s27, %s2919_s7 }
  0x27   :  { %p2238_p10 = pnand %p2236_p9, %p2233_p8 }
  0x29   :  { %2241 = shalt.err (!%p2238_p10)
}
  0x2a   :  { %s2242_s22 = scalar_lea.vmem %s80_s23, 8192  ;;  %p2247_p12 = scmp.lt.s32.totalorder %s80_s23, %s80_s23 }
  0x2b   :  { %p2243_p11 = scmp.ne.s32.totalorder %s80_s23, %s2242_s22  ;;  %p2248_p13 = scmp.lt.s32.totalorder %s2242_s22, %s2242_s22 }
  0x2d   :  { %p2249_p0 = por %p2248_p13, %p2247_p12 }
  0x2f   :  { %p2250_p1 = pnand %p2249_p0, %p2243_p11 }
  0x31   :  { %2253 = shalt.err (!%p2250_p1)
}
  0x32   :  { %85 = dma.hbm_to_vmem [thread:$0]  %s2919_s7, 8192, %s80_s23, [#allocation8], %s2397_s29, %s2397_s29, %s2398_s30  }
  0x33   :  { %s2254_s20 = scalar_lea.hbm %s2924_s12, 8192 }
  0x34   :  { %p2255_p2 = scmp.ne.s32.totalorder %s2924_s12, %s2254_s20  ;;  %p2258_p3 = scmp.lt.u32.totalorder %s2254_s20, %s2924_s12 }
  0x36   :  { %p2260_p4 = pnand %p2258_p3, %p2255_p2 }
  0x38   :  { %2263 = shalt.err (!%p2260_p4)
}
  0x39   :  { %s2264_s27 = scalar_lea.vmem %s110_s25, 8192  ;;  %p2269_p6 = scmp.lt.s32.totalorder %s110_s25, %s110_s25 }
  0x3a   :  { %p2265_p5 = scmp.ne.s32.totalorder %s110_s25, %s2264_s27  ;;  %p2270_p7 = scmp.lt.s32.totalorder %s2264_s27, %s2264_s27 }
  0x3c   :  { %p2271_p8 = por %p2270_p7, %p2269_p6 }
  0x3e   :  { %p2272_p9 = pnand %p2271_p8, %p2265_p5 }
  0x40   :  { %2275 = shalt.err (!%p2272_p9)
}
  0x41   :  { %115 = dma.hbm_to_vmem [thread:$0]  %s2924_s12, 8192, %s110_s25, [#allocation11], %s2397_s29, %s2397_s29, %s2398_s30  }
  0x42   :  { %s2401_s28 = smov [#allocation2]   ;;  %s2945_s0 = sld [smem:[#allocation20_spill]] }
  0x43   :  { %s35_s4 = sshll.u32 %s2401_s28, 4  ;;  %s36_s4 = int_to_ptr.vmem [resolvable:$true] %s35_s4 }
  0x48   :  { %s2276_s21 = scalar_lea.hbm %s2945_s0, 256 }
  0x49   :  { %p2277_p10 = scmp.ne.s32.totalorder %s2945_s0, %s2276_s21  ;;  %p2280_p11 = scmp.lt.u32.totalorder %s2276_s21, %s2945_s0 }
  0x4b   :  { %p2282_p12 = pnand %p2280_p11, %p2277_p10 }
  0x4d   :  { %2285 = shalt.err (!%p2282_p12)
}
  0x4e   :  { %s2286_s3 = scalar_lea.vmem %s36_s4, 256  ;;  %p2291_p0 = scmp.lt.s32.totalorder %s36_s4, %s36_s4 }
  0x4f   :  { %p2287_p13 = scmp.ne.s32.totalorder %s36_s4, %s2286_s3  ;;  %p2292_p1 = scmp.lt.s32.totalorder %s2286_s3, %s2286_s3 }
  0x51   :  { %p2293_p2 = por %p2292_p1, %p2291_p0 }
  0x53   :  { %p2294_p3 = pnand %p2293_p2, %p2287_p13 }
  0x55   :  { %2297 = shalt.err (!%p2294_p3)
}
  0x56   :  { %s2402_s12 = smov 128   ;;  %s2403_s25 = smov 8  }
  0x57   :  { %41 = dma.hbm_to_vmem [thread:$0]  %s2945_s0, 256, %s36_s4, [#allocation3], %s2402_s12, %s2402_s12, %s2403_s25  }
  0x58   :  { %s2404_s7 = smov [#allocation6]   ;;  %s2405_s28 = smov [#allocation9]  }
  0x59   :  { %s65_s23 = sshll.u32 %s2404_s7, 4  ;;  %s95_s22 = sshll.u32 %s2405_s28, 4  ;;  %s66_s23 = int_to_ptr.vmem [resolvable:$true] %s65_s23  ;;  %s2572_s22 = int_to_ptr.vmem [resolvable:$true] %s95_s22 }
  0x5a   :  { %s2298_s19 = scalar_lea.hbm %s2917_s5, 8192 }
  0x5b   :  { %p2299_p4 = scmp.ne.s32.totalorder %s2917_s5, %s2298_s19  ;;  %p2302_p5 = scmp.lt.u32.totalorder %s2298_s19, %s2917_s5 }
  0x5d   :  { %p2304_p6 = pnand %p2302_p5, %p2299_p4 }
  0x5f   :  { %2307 = shalt.err (!%p2304_p6)
}
  0x60   :  { %s2308_s4 = scalar_lea.vmem %s66_s23, 8192  ;;  %p2313_p8 = scmp.lt.s32.totalorder %s66_s23, %s66_s23 }
  0x61   :  { %p2309_p7 = scmp.ne.s32.totalorder %s66_s23, %s2308_s4  ;;  %p2314_p9 = scmp.lt.s32.totalorder %s2308_s4, %s2308_s4 }
  0x63   :  { %p2315_p10 = por %p2314_p9, %p2313_p8 }
  0x65   :  { %p2316_p11 = pnand %p2315_p10, %p2309_p7 }
  0x67   :  { %2319 = shalt.err (!%p2316_p11)
}
  0x68   :  { %71 = dma.hbm_to_vmem [thread:$0]  %s2917_s5, 8192, %s66_s23, [#allocation5], %s2397_s29, %s2397_s29, %s2398_s30  }
  0x69   :  { %s2320_s27 = scalar_lea.hbm %s2922_s10, 8192 }
  0x6a   :  { %p2321_p12 = scmp.ne.s32.totalorder %s2922_s10, %s2320_s27  ;;  %p2324_p13 = scmp.lt.u32.totalorder %s2320_s27, %s2922_s10 }
  0x6c   :  { %p2326_p0 = pnand %p2324_p13, %p2321_p12 }
  0x6e   :  { %2329 = shalt.err (!%p2326_p0)
}
  0x6f   :  { %s2330_s19 = scalar_lea.vmem %s2572_s22, 8192  ;;  %p2335_p2 = scmp.lt.s32.totalorder %s2572_s22, %s2572_s22 }
  0x70   :  { %p2331_p1 = scmp.ne.s32.totalorder %s2572_s22, %s2330_s19  ;;  %p2336_p3 = scmp.lt.s32.totalorder %s2330_s19, %s2330_s19 }
  0x72   :  { %p2337_p4 = por %p2336_p3, %p2335_p2 }
  0x74   :  { %p2338_p5 = pnand %p2337_p4, %p2331_p1 }
  0x76   :  { %2341 = shalt.err (!%p2338_p5)
}
  0x77   :  { %101 = dma.hbm_to_vmem [thread:$0]  %s2922_s10, 8192, %s2572_s22, [#allocation8], %s2397_s29, %s2397_s29, %s2398_s30  }
  0x78   :  { %s2406_s20 = smov [#allocation12]   ;;  %s2407_s24 = smov [#allocation13]  }
  0x79   :  { %s123_s1 = sshll.u32 %s2406_s20, 4  ;;  %s137_s3 = sshll.u32 %s2407_s24, 4  ;;  %s124_s1 = int_to_ptr.vmem [resolvable:$true] %s123_s1  ;;  %s2609_s3 = int_to_ptr.vmem [resolvable:$true] %s137_s3 }
  0x7a   :  { %s2342_s12 = scalar_lea.hbm %s2926_s14, 8192 }
  0x7b   :  { %p2343_p6 = scmp.ne.s32.totalorder %s2926_s14, %s2342_s12  ;;  %p2346_p7 = scmp.lt.u32.totalorder %s2342_s12, %s2926_s14 }
  0x7d   :  { %p2348_p8 = pnand %p2346_p7, %p2343_p6 }
  0x7f   :  { %2351 = shalt.err (!%p2348_p8)
}
  0x80   :  { %s2352_s10 = scalar_lea.vmem %s124_s1, 8192  ;;  %p2357_p10 = scmp.lt.s32.totalorder %s124_s1, %s124_s1 }
  0x81   :  { %p2353_p9 = scmp.ne.s32.totalorder %s124_s1, %s2352_s10  ;;  %p2358_p11 = scmp.lt.s32.totalorder %s2352_s10, %s2352_s10 }
  0x83   :  { %p2359_p12 = por %p2358_p11, %p2357_p10 }
  0x85   :  { %p2360_p13 = pnand %p2359_p12, %p2353_p9 }
  0x87   :  { %2363 = shalt.err (!%p2360_p13)
}
  0x88   :  { %129 = dma.hbm_to_vmem [thread:$0]  %s2926_s14, 8192, %s124_s1, [#allocation11], %s2397_s29, %s2397_s29, %s2398_s30  }
  0x89   :  { %s2364_s19 = scalar_lea.hbm %s2928_s16, 8192 }
  0x8a   :  { %p2365_p0 = scmp.ne.s32.totalorder %s2928_s16, %s2364_s19  ;;  %p2368_p1 = scmp.lt.u32.totalorder %s2364_s19, %s2928_s16 }
  0x8c   :  { %p2370_p2 = pnand %p2368_p1, %p2365_p0 }
  0x8e   :  { %2373 = shalt.err (!%p2370_p2)
}
  0x8f   :  { %s2374_s4 = scalar_lea.vmem %s2609_s3, 8192  ;;  %p2379_p4 = scmp.lt.s32.totalorder %s2609_s3, %s2609_s3 }
  0x90   :  { %p2375_p3 = scmp.ne.s32.totalorder %s2609_s3, %s2374_s4  ;;  %p2380_p5 = scmp.lt.s32.totalorder %s2374_s4, %s2374_s4 }
  0x92   :  { %p2381_p6 = por %p2380_p5, %p2379_p4 }
  0x94   :  { %p2382_p7 = pnand %p2381_p6, %p2375_p3 }
  0x96   :  { %2385 = shalt.err (!%p2382_p7)
}
  0x97   :  { %143 = dma.hbm_to_vmem [thread:$0]  %s2928_s16, 8192, %s2609_s3, [#allocation14], %s2397_s29, %s2397_s29, %s2398_s30  }
  0x98   :  { %2386 = dma.done.wait [#allocation3], 256  }
  0x99   :  { %2387 = vsyncadd [#allocation3], 4294967040 }
  0x9a   :  { %2388 = dma.done.wait [#allocation5], 16384  }
  0x9b   :  { %2389 = vsyncadd [#allocation5], 4294950912 }
  0x9c   :  { %2390 = dma.done.wait [#allocation8], 16384  }
  0x9d   :  { %2391 = vsyncadd [#allocation8], 4294950912 }
  0x9e   :  { %2392 = dma.done.wait [#allocation11], 16384  }
  0x9f   :  { %2393 = vsyncadd [#allocation11], 4294950912 }
  0xa0   :  { %2394 = dma.done.wait [#allocation14], 8192  }
  0xa1   :  { %2395 = vsyncadd [#allocation14], 4294959104  ;;  %v2408_v0 = vmov 0.0   ;;  %s2946_s25 = sld [smem:[#allocation21_spill]]  ;;  %v300_v20 = vld [vmem:[#allocation4 + $0x8] sm:$0xff]  ;;  %v302_v21 = vld [vmem:[#allocation4 + $0x18] sm:$0xff] }
  0xa2   :  { %282 = vmatprep.mubr.f32.mxu0 %v2408_v0  ;;  %v299_v22 = vld [vmem:[#allocation4] sm:$0xff]  ;;  %vm211_vm0 = vcmask 1046528   ;;  %v1692_v23 = vpack.c.bf16 %v302_v21, %v300_v20  ;;  %v301_v24 = vld [vmem:[#allocation4 + $0x10] sm:$0xff]  ;;  %v304_v25 = vld [vmem:[#allocation4 + $0x28] sm:$0xff]  ;;  %vm2409_vm1 = vmmov 1   ;;  %vm204_vm3 = vcmask 515072  }
  0xa3   :  { %v306_v26 = vld [vmem:[#allocation4 + $0x38] sm:$0xff]  ;;  %v1694_v28 = vpack.c.bf16 %v301_v24, %v299_v22  ;;  %v303_v30 = vld [vmem:[#allocation4 + $0x20] sm:$0xff]  ;;  %v305_v31 = vld [vmem:[#allocation4 + $0x30] sm:$0xff]  ;;  %s2949_s28 = sld [smem:[#allocation22_spill]]  ;;  %s2950_s19 = sld [smem:[#allocation24_spill]]  ;;  %vm1615_vm4 = vcmask 23552  }
  0xa4   :  { %v1696_v29 = vpack.c.bf16 %v306_v26, %v304_v25  ;;  %v308_v32 = vld [vmem:[#allocation4 + $0x48] sm:$0xff]  ;;  %1693 = vmatprep.subr.bf16.mxu1 %v1692_v23  ;;  %v310_v36 = vld [vmem:[#allocation4 + $0x58] sm:$0xff]  ;;  %vm2696_vm2 = vmpackc.low %vm211_vm0, %vm2409_vm1  ;;  %v1698_v38 = vpack.c.bf16 %v305_v31, %v303_v30  ;;  %s2951_s21 = sld [smem:[#allocation25_spill]]  ;;  %s2952_s23 = sld [smem:[#allocation26_spill]] }
  0xa5   :  { %1695 = vmatpush1.bf16.msra.mxu1 %v1694_v28  ;;  %v1700_v39 = vpack.c.bf16 %v310_v36, %v308_v32  ;;  %v307_v40 = vld [vmem:[#allocation4 + $0x40] sm:$0xff]  ;;  %v309_v41 = vld [vmem:[#allocation4 + $0x50] sm:$0xff]  ;;  %v312_v43 = vld [vmem:[#allocation4 + $0x68] sm:$0xff] }
  0xa6   :  { %1697 = vmatprep.subr.bf16.mxu1 %v1696_v29  ;;  %v314_v44 = vld [vmem:[#allocation4 + $0x78] sm:$0xff]  ;;  %v1702_v45 = vpack.c.bf16 %v309_v41, %v307_v40  ;;  %v311_v47 = vld [vmem:[#allocation4 + $0x60] sm:$0xff]  ;;  %v313_v48 = vld [vmem:[#allocation4 + $0x70] sm:$0xff] }
  0xa7   :  { %v177_v1 = vld [vmem:[%s2946_s25 + $0x8] sm:$0xff]  ;;  %v179_v2 = vld [vmem:[%s2946_s25 + $0x18] sm:$0xff]  ;;  %v176_v3 = vld [vmem:[%s2946_s25] sm:$0xff]  ;;  %v1704_v46 = vpack.c.bf16 %v314_v44, %v312_v43  ;;  %v1706_v52 = vpack.c.bf16 %v313_v48, %v311_v47 }
  0xa8   :  { %v1674_v4 = vpack.c.bf16 %v179_v2, %v177_v1  ;;  %v178_v5 = vld [vmem:[%s2946_s25 + $0x10] sm:$0xff]  ;;  %v181_v6 = vld [vmem:[%s2946_s25 + $0x28] sm:$0xff]  ;;  %v183_v7 = vld [vmem:[%s2946_s25 + $0x38] sm:$0xff] }
  0xa9   :  { %v1676_v8 = vpack.c.bf16 %v178_v5, %v176_v3  ;;  %v1678_v9 = vpack.c.bf16 %v183_v7, %v181_v6  ;;  %v180_v10 = vld [vmem:[%s2946_s25 + $0x20] sm:$0xff]  ;;  %v182_v11 = vld [vmem:[%s2946_s25 + $0x30] sm:$0xff]  ;;  %v185_v12 = vld [vmem:[%s2946_s25 + $0x48] sm:$0xff]  ;;  %1699 = vmatpush1.bf16.msra.mxu1 %v1698_v38 }
  0xaa   :  { %1675 = vmatprep.subr.bf16.mxu0 %v1674_v4  ;;  %v187_v13 = vld [vmem:[%s2946_s25 + $0x58] sm:$0xff]  ;;  %v1680_v14 = vpack.c.bf16 %v182_v11, %v180_v10  ;;  %v184_v15 = vld [vmem:[%s2946_s25 + $0x40] sm:$0xff]  ;;  %v186_v17 = vld [vmem:[%s2946_s25 + $0x50] sm:$0xff]  ;;  %1701 = vmatprep.subr.bf16.mxu1 %v1700_v39 }
  0xab   :  { %1677 = vmatpush1.bf16.msra.mxu0 %v1676_v8  ;;  %v1682_v16 = vpack.c.bf16 %v187_v13, %v185_v12  ;;  %v189_v18 = vld [vmem:[%s2946_s25 + $0x68] sm:$0xff]  ;;  %v191_v19 = vld [vmem:[%s2946_s25 + $0x78] sm:$0x7f]  ;;  %v1684_v27 = vpack.c.bf16 %v186_v17, %v184_v15  ;;  %v188_v34 = vld [vmem:[%s2946_s25 + $0x60] sm:$0xff] }
  0xac   :  { %1679 = vmatprep.subr.bf16.mxu0 %v1678_v9  ;;  %v1686_v33 = vpack.c.bf16 %v191_v19, %v189_v18  ;;  %v190_v35 = vld [vmem:[%s2946_s25 + $0x70] sm:$0x7f]  ;;  %v174_v49 = vld [vmem:[#allocation2] sm:$0xff]  ;;  %v316_v50 = vld [vmem:[#allocation4 + $0x88] sm:$0xff] }
  0xad   :  { %v1689_v42 = vpack.c.bf16 %v190_v35, %v188_v34  ;;  %v318_v51 = vld [vmem:[#allocation4 + $0x98] sm:$0xff]  ;;  %1703 = vmatpush1.bf16.msra.mxu1 %v1702_v45  ;;  %v315_v54 = vld [vmem:[#allocation4 + $0x80] sm:$0xff]  ;;  %v317_v55 = vld [vmem:[#allocation4 + $0x90] sm:$0xff] }
  0xae   :  { %1705 = vmatprep.subr.bf16.mxu1 %v1704_v46  ;;  %v1708_v53 = vpack.c.bf16 %v318_v51, %v316_v50  ;;  %v175_v56 = vld [vmem:[#allocation2 + $0x8] sm:$0xff]  ;;  %v320_v57 = vld [vmem:[#allocation4 + $0xa8] sm:$0xff]  ;;  %v1710_v59 = vpack.c.bf16 %v317_v55, %v315_v54  ;;  %v319_v61 = vld [vmem:[#allocation4 + $0xa0] sm:$0xff] }
  0xaf   :  { %1681 = vmatpush1.bf16.msra.mxu0 %v1680_v14  ;;  %v322_v58 = vld [vmem:[#allocation4 + $0xb8] sm:$0xff]  ;;  %v321_v62 = vld [vmem:[#allocation4 + $0xb0] sm:$0xff]  ;;  %v324_v63 = vld [vmem:[#allocation4 + $0xc8] sm:$0xff] }
  0xb0   :  { %1683 = vmatprep.subr.bf16.mxu0 %v1682_v16  ;;  %v1712_v60 = vpack.c.bf16 %v322_v58, %v320_v57  ;;  %v326_v1 = vld [vmem:[#allocation4 + $0xd8] sm:$0xff]  ;;  %v1714_v2 = vpack.c.bf16 %v321_v62, %v319_v61  ;;  %v323_v4 = vld [vmem:[#allocation4 + $0xc0] sm:$0xff]  ;;  %v325_v5 = vld [vmem:[#allocation4 + $0xd0] sm:$0xff] }
  0xb1   :  { %1707 = vmatpush1.bf16.msra.mxu1 %v1706_v52  ;;  %v1716_v3 = vpack.c.bf16 %v326_v1, %v324_v63  ;;  %v328_v6 = vld [vmem:[#allocation4 + $0xe8] sm:$0xff]  ;;  %v330_v7 = vld [vmem:[#allocation4 + $0xf8] sm:$0xff]  ;;  %v1718_v8 = vpack.c.bf16 %v325_v5, %v323_v4  ;;  %v327_v10 = vld [vmem:[#allocation4 + $0xe0] sm:$0xff] }
  0xb2   :  { %1709 = vmatprep.subr.bf16.mxu1 %v1708_v53  ;;  %v1720_v9 = vpack.c.bf16 %v330_v7, %v328_v6  ;;  %v329_v11 = vld [vmem:[#allocation4 + $0xf0] sm:$0xff]  ;;  %v332_v12 = vld [vmem:[#allocation4 + $0x108] sm:$0xff]  ;;  %v334_v13 = vld [vmem:[#allocation4 + $0x118] sm:$0xff] }
  0xb3   :  { %1685 = vmatpush1.bf16.msra.mxu0 %v1684_v27  ;;  %v1722_v14 = vpack.c.bf16 %v329_v11, %v327_v10  ;;  %v1724_v15 = vpack.c.bf16 %v334_v13, %v332_v12  ;;  %v331_v16 = vld [vmem:[#allocation4 + $0x100] sm:$0xff]  ;;  %v333_v17 = vld [vmem:[#allocation4 + $0x110] sm:$0xff]  ;;  %v336_v18 = vld [vmem:[#allocation4 + $0x128] sm:$0xff] }
  0xb4   :  { %1688 = vmatprep.subr.msk.bf16.mxu0 %vm2696_vm2, %v1686_v33  ;;  %v338_v19 = vld [vmem:[#allocation4 + $0x138] sm:$0xff]  ;;  %v1726_v20 = vpack.c.bf16 %v333_v17, %v331_v16  ;;  %v335_v22 = vld [vmem:[#allocation4 + $0x120] sm:$0xff]  ;;  %v337_v23 = vld [vmem:[#allocation4 + $0x130] sm:$0xff] }
  0xb5   :  { %1711 = vmatpush1.bf16.msra.mxu1 %v1710_v59  ;;  %v1728_v21 = vpack.c.bf16 %v338_v19, %v336_v18  ;;  %v340_v24 = vld [vmem:[#allocation4 + $0x148] sm:$0xff]  ;;  %v342_v25 = vld [vmem:[#allocation4 + $0x158] sm:$0xff]  ;;  %v1730_v26 = vpack.c.bf16 %v337_v23, %v335_v22  ;;  %v339_v28 = vld [vmem:[#allocation4 + $0x140] sm:$0xff] }
  0xb6   :  { %1713 = vmatprep.subr.bf16.mxu1 %v1712_v60  ;;  %v1732_v27 = vpack.c.bf16 %v342_v25, %v340_v24  ;;  %v341_v29 = vld [vmem:[#allocation4 + $0x150] sm:$0xff]  ;;  %v344_v30 = vld [vmem:[#allocation4 + $0x168] sm:$0xff]  ;;  %v346_v31 = vld [vmem:[#allocation4 + $0x178] sm:$0xff] }
  0xb7   :  { %1691 = vmatpush1.bf16.msk.msra.mxu0 %vm2696_vm2, %v1689_v42  ;;  %v1734_v32 = vpack.c.bf16 %v341_v29, %v339_v28  ;;  %v1736_v33 = vpack.c.bf16 %v346_v31, %v344_v30  ;;  %v343_v34 = vld [vmem:[#allocation4 + $0x160] sm:$0xff]  ;;  %v345_v35 = vld [vmem:[#allocation4 + $0x170] sm:$0xff]  ;;  %v348_v36 = vld [vmem:[#allocation4 + $0x188] sm:$0xff] }
  0xb8   :  { %v350_v38 = vld [vmem:[#allocation4 + $0x198] sm:$0xff]  ;;  %v1738_v39 = vpack.c.bf16 %v345_v35, %v343_v34  ;;  %v347_v41 = vld [vmem:[#allocation4 + $0x180] sm:$0xff]  ;;  %v349_v42 = vld [vmem:[#allocation4 + $0x190] sm:$0xff] }
  0xb9   :  { %1715 = vmatpush1.bf16.msra.mxu1 %v1714_v2  ;;  %v1740_v40 = vpack.c.bf16 %v350_v38, %v348_v36  ;;  %v352_v43 = vld [vmem:[#allocation4 + $0x1a8] sm:$0xff]  ;;  %v354_v44 = vld [vmem:[#allocation4 + $0x1b8] sm:$0xff]  ;;  %v1742_v45 = vpack.c.bf16 %v349_v42, %v347_v41  ;;  %v351_v47 = vld [vmem:[#allocation4 + $0x1a0] sm:$0xff] }
  0xba   :  { %1629 = vmatmul.mubr.msk.f32.vlgmr.msra.gmra.mrb[0].mxu0 %vm204_vm3, %v174_v49  ;;  %1717 = vmatprep.subr.bf16.mxu1 %v1716_v3  ;;  %v1744_v46 = vpack.c.bf16 %v354_v44, %v352_v43  ;;  %v353_v48 = vld [vmem:[#allocation4 + $0x1b0] sm:$0xff]  ;;  %v356_v49 = vld [vmem:[#allocation4 + $0x1c8] sm:$0xff]  ;;  %v358_v50 = vld [vmem:[#allocation4 + $0x1d8] sm:$0xff] }
  0xbb   :  { %288 = vmatprep.mubr.f32.mxu0 %v2408_v0  ;;  %v1746_v51 = vpack.c.bf16 %v353_v48, %v351_v47  ;;  %v1748_v52 = vpack.c.bf16 %v358_v50, %v356_v49  ;;  %v355_v53 = vld [vmem:[#allocation4 + $0x1c0] sm:$0xff]  ;;  %v357_v54 = vld [vmem:[#allocation4 + $0x1d0] sm:$0xff]  ;;  %v362_v57 = vld [vmem:[#allocation4 + $0x1f8] sm:$0xff] }
  0xbc   :  { %v1750_v55 = vpack.c.bf16 %v357_v54, %v355_v53  ;;  %v359_v59 = vld [vmem:[#allocation4 + $0x1e0] sm:$0xff]  ;;  %v361_v60 = vld [vmem:[#allocation4 + $0x1f0] sm:$0xff]  ;;  %v457_v62 = vld [vmem:[#allocation6 + $0x8] sm:$0xff] }
  0xbd   :  { %1719 = vmatpush1.bf16.msra.mxu1 %v1718_v8  ;;  %v1754_v61 = vpack.c.bf16 %v361_v60, %v359_v59  ;;  %v459_v63 = vld [vmem:[#allocation6 + $0x18] sm:$0xff]  ;;  %v456_v1 = vld [vmem:[#allocation6] sm:$0xff]  ;;  %v458_v3 = vld [vmem:[#allocation6 + $0x10] sm:$0xff] }
  0xbe   :  { %1630 = vmatmul.mubr.msk.f32.gmra.mrb[2].mxu0 %vm204_vm3, %v175_v56  ;;  %1721 = vmatprep.subr.bf16.mxu1 %v1720_v9  ;;  %v360_v56 = vld [vmem:[#allocation4 + $0x1e8] sm:$0xff]  ;;  %v1756_v2 = vpack.c.bf16 %v459_v63, %v457_v62  ;;  %v463_v5 = vld [vmem:[#allocation6 + $0x38] sm:$0xff]  ;;  %v1758_v6 = vpack.c.bf16 %v458_v3, %v456_v1  ;;  %v460_v8 = vld [vmem:[#allocation6 + $0x20] sm:$0xff] }
  0xbf   :  { %v1752_v58 = vpack.c.bf16 %v362_v57, %v360_v56  ;;  %v461_v4 = vld [vmem:[#allocation6 + $0x28] sm:$0xff]  ;;  %v462_v9 = vld [vmem:[#allocation6 + $0x30] sm:$0xff]  ;;  %v467_v11 = vld [vmem:[#allocation6 + $0x58] sm:$0xff] }
  0xc0   :  { %v1760_v7 = vpack.c.bf16 %v463_v5, %v461_v4  ;;  %v465_v10 = vld [vmem:[#allocation6 + $0x48] sm:$0xff]  ;;  %1757 = vmatprep.subr.bf16.mxu0 %v1756_v2  ;;  %v1762_v12 = vpack.c.bf16 %v462_v9, %v460_v8  ;;  %v471_v17 = vld [vmem:[#allocation6 + $0x78] sm:$0xff]  ;;  %v492_v57 = vld [vmem:[#allocation6 + $0x120] sm:$0xff] }
  0xc1   :  { %1723 = vmatpush1.bf16.msra.mxu1 %v1722_v14  ;;  %1759 = vmatpush1.bf16.msra.mxu0 %v1758_v6  ;;  %v1764_v13 = vpack.c.bf16 %v467_v11, %v465_v10  ;;  %v464_v14 = vld [vmem:[#allocation6 + $0x40] sm:$0xff]  ;;  %v469_v16 = vld [vmem:[#allocation6 + $0x68] sm:$0xff]  ;;  %v475_v23 = vld [vmem:[#allocation6 + $0x98] sm:$0xff] }
  0xc2   :  { %1725 = vmatprep.subr.bf16.mxu1 %v1724_v15  ;;  %1761 = vmatprep.subr.bf16.mxu0 %v1760_v7  ;;  %v466_v15 = vld [vmem:[#allocation6 + $0x50] sm:$0xff]  ;;  %v1768_v19 = vpack.c.bf16 %v471_v17, %v469_v16  ;;  %v473_v22 = vld [vmem:[#allocation6 + $0x88] sm:$0xff]  ;;  %v479_v29 = vld [vmem:[#allocation6 + $0xb8] sm:$0xff] }
  0xc3   :  { %v1766_v18 = vpack.c.bf16 %v466_v15, %v464_v14  ;;  %v1772_v25 = vpack.c.bf16 %v475_v23, %v473_v22  ;;  %v477_v28 = vld [vmem:[#allocation6 + $0xa8] sm:$0xff]  ;;  %v483_v35 = vld [vmem:[#allocation6 + $0xd8] sm:$0xff]  ;;  %v496_v63 = vld [vmem:[#allocation6 + $0x140] sm:$0xff] }
  0xc4   :  { %v1776_v31 = vpack.c.bf16 %v479_v29, %v477_v28  ;;  %v481_v34 = vld [vmem:[#allocation6 + $0xc8] sm:$0xff]  ;;  %v487_v42 = vld [vmem:[#allocation6 + $0xf8] sm:$0xff]  ;;  %v498_v1 = vld [vmem:[#allocation6 + $0x150] sm:$0xff] }
  0xc5   :  { %1727 = vmatpush1.bf16.msra.mxu1 %v1726_v20  ;;  %1763 = vmatpush1.bf16.msra.mxu0 %v1762_v12  ;;  %v468_v20 = vld [vmem:[#allocation6 + $0x60] sm:$0xff]  ;;  %v1780_v38 = vpack.c.bf16 %v483_v35, %v481_v34  ;;  %v485_v41 = vld [vmem:[#allocation6 + $0xe8] sm:$0xff]  ;;  %v491_v48 = vld [vmem:[#allocation6 + $0x118] sm:$0xff]  ;;  %v1798_v4 = vpack.c.bf16 %v498_v1, %v496_v63 }
  0xc6   :  { %1729 = vmatprep.subr.bf16.mxu1 %v1728_v21  ;;  %1765 = vmatprep.subr.bf16.mxu0 %v1764_v13  ;;  %v470_v21 = vld [vmem:[#allocation6 + $0x70] sm:$0xff]  ;;  %v1784_v44 = vpack.c.bf16 %v487_v42, %v485_v41  ;;  %v489_v47 = vld [vmem:[#allocation6 + $0x108] sm:$0xff]  ;;  %v495_v54 = vld [vmem:[#allocation6 + $0x138] sm:$0xff] }
  0xc7   :  { %v1770_v24 = vpack.c.bf16 %v470_v21, %v468_v20  ;;  %v1788_v50 = vpack.c.bf16 %v491_v48, %v489_v47  ;;  %v493_v53 = vld [vmem:[#allocation6 + $0x128] sm:$0xff]  ;;  %v499_v60 = vld [vmem:[#allocation6 + $0x158] sm:$0xff]  ;;  %v500_v6 = vld [vmem:[#allocation6 + $0x160] sm:$0xff] }
  0xc8   :  { %v1792_v56 = vpack.c.bf16 %v495_v54, %v493_v53  ;;  %v497_v59 = vld [vmem:[#allocation6 + $0x148] sm:$0xff]  ;;  %v503_v3 = vld [vmem:[#allocation6 + $0x178] sm:$0xff]  ;;  %v502_v7 = vld [vmem:[#allocation6 + $0x170] sm:$0xff] }
  0xc9   :  { %1731 = vmatpush1.bf16.msra.mxu1 %v1730_v26  ;;  %1767 = vmatpush1.bf16.msra.mxu0 %v1766_v18  ;;  %v472_v26 = vld [vmem:[#allocation6 + $0x80] sm:$0xff]  ;;  %v1796_v62 = vpack.c.bf16 %v499_v60, %v497_v59  ;;  %v501_v2 = vld [vmem:[#allocation6 + $0x168] sm:$0xff]  ;;  %v507_v9 = vld [vmem:[#allocation6 + $0x198] sm:$0xff]  ;;  %v1802_v10 = vpack.c.bf16 %v502_v7, %v500_v6 }
  0xca   :  { %1733 = vmatprep.subr.bf16.mxu1 %v1732_v27  ;;  %1769 = vmatprep.subr.bf16.mxu0 %v1768_v19  ;;  %v474_v27 = vld [vmem:[#allocation6 + $0x90] sm:$0xff]  ;;  %v1800_v5 = vpack.c.bf16 %v503_v3, %v501_v2  ;;  %v505_v8 = vld [vmem:[#allocation6 + $0x188] sm:$0xff]  ;;  %v504_v12 = vld [vmem:[#allocation6 + $0x180] sm:$0xff] }
  0xcb   :  { %v1774_v30 = vpack.c.bf16 %v474_v27, %v472_v26  ;;  %v1804_v11 = vpack.c.bf16 %v507_v9, %v505_v8  ;;  %v506_v13 = vld [vmem:[#allocation6 + $0x190] sm:$0xff]  ;;  %v509_v14 = vld [vmem:[#allocation6 + $0x1a8] sm:$0xff]  ;;  %v511_v15 = vld [vmem:[#allocation6 + $0x1b8] sm:$0xff] }
  0xcc   :  { %v1806_v16 = vpack.c.bf16 %v506_v13, %v504_v12  ;;  %v1808_v17 = vpack.c.bf16 %v511_v15, %v509_v14  ;;  %v508_v18 = vld [vmem:[#allocation6 + $0x1a0] sm:$0xff]  ;;  %v510_v19 = vld [vmem:[#allocation6 + $0x1b0] sm:$0xff]  ;;  %v513_v20 = vld [vmem:[#allocation6 + $0x1c8] sm:$0xff] }
  0xcd   :  { %1735 = vmatpush1.bf16.msra.mxu1 %v1734_v32  ;;  %1771 = vmatpush1.bf16.msra.mxu0 %v1770_v24  ;;  %v476_v32 = vld [vmem:[#allocation6 + $0xa0] sm:$0xff]  ;;  %v515_v21 = vld [vmem:[#allocation6 + $0x1d8] sm:$0xff]  ;;  %v1810_v22 = vpack.c.bf16 %v510_v19, %v508_v18  ;;  %v194_v24 = vlaneseq  ;;  %v192_v27 = vld [vmem:[%s2949_s28] sm:$0x3] }
  0xce   :  { %1737 = vmatprep.subr.bf16.mxu1 %v1736_v33  ;;  %1773 = vmatprep.subr.bf16.mxu0 %v1772_v25  ;;  %v478_v33 = vld [vmem:[#allocation6 + $0xb0] sm:$0xff]  ;;  %v1812_v23 = vpack.c.bf16 %v515_v21, %v513_v20  ;;  %v517_v47 = vld [vmem:[#allocation6 + $0x1e8] sm:$0xff]  ;;  %v519_v48 = vld [vmem:[#allocation6 + $0x1f8] sm:$0xff] }
  0xcf   :  { %v1778_v36 = vpack.c.bf16 %v478_v33, %v476_v32  ;;  %v195_v25 = vshrl.u32 %v194_v24, 7  ;;  %v614_v53 = vld [vmem:[#allocation7 + $0x8] sm:$0xff]  ;;  %v616_v54 = vld [vmem:[#allocation7 + $0x18] sm:$0xff]  ;;  %v619_v63 = vld [vmem:[#allocation7 + $0x30] sm:$0xff] }
  0xd0   :  { %v620_v59 = vld [vmem:[#allocation7 + $0x38] sm:$0xff]  ;;  %v622_v1 = vld [vmem:[#allocation7 + $0x48] sm:$0xff]  ;;  %v623_v6 = vld [vmem:[#allocation7 + $0x50] sm:$0xff] }
  0xd1   :  { %1739 = vmatpush1.bf16.msra.mxu1 %v1738_v39  ;;  %1775 = vmatpush1.bf16.msra.mxu0 %v1774_v30  ;;  %v480_v39 = vld [vmem:[#allocation6 + $0xc0] sm:$0xff]  ;;  %v2707_v26 = vsub.s32 0, %v195_v25  ;;  %v2712_v28 = vsub.s32 1, %v195_v25  ;;  %v624_v2 = vld [vmem:[#allocation7 + $0x58] sm:$0xff]  ;;  %v626_v7 = vld [vmem:[#allocation7 + $0x68] sm:$0xff] }
  0xd2   :  { %1741 = vmatprep.subr.bf16.mxu1 %v1740_v40  ;;  %1777 = vmatprep.subr.bf16.mxu0 %v1776_v31  ;;  %v482_v40 = vld [vmem:[#allocation6 + $0xd0] sm:$0xff]  ;;  %v628_v8 = vld [vmem:[#allocation7 + $0x78] sm:$0xff]  ;;  %v630_v13 = vld [vmem:[#allocation7 + $0x88] sm:$0xff] }
  0xd3   :  { %v1782_v43 = vpack.c.bf16 %v482_v40, %v480_v39  ;;  %v197_v29 = vrot.slane %v192_v27, %v2707_v26  ;;  %v201_v30 = vrot.slane %v192_v27, %v2712_v28  ;;  %v627_v12 = vld [vmem:[#allocation7 + $0x70] sm:$0xff]  ;;  %v632_v14 = vld [vmem:[#allocation7 + $0x98] sm:$0xff]  ;;  %v634_v19 = vld [vmem:[#allocation7 + $0xa8] sm:$0xff] }
  0xd4   :  { %v631_v18 = vld [vmem:[#allocation7 + $0x90] sm:$0xff]  ;;  %v636_v20 = vld [vmem:[#allocation7 + $0xb8] sm:$0xff]  ;;  %v638_v25 = vld [vmem:[#allocation7 + $0xc8] sm:$0xff] }
  0xd5   :  { %1743 = vmatpush1.bf16.msra.mxu1 %v1742_v45  ;;  %1779 = vmatpush1.bf16.msra.mxu0 %v1778_v36  ;;  %v484_v45 = vld [vmem:[#allocation6 + $0xe0] sm:$0xff]  ;;  %v635_v24 = vld [vmem:[#allocation7 + $0xb0] sm:$0xff]  ;;  %v640_v27 = vld [vmem:[#allocation7 + $0xd8] sm:$0xff] }
  0xd6   :  { %1745 = vmatprep.subr.bf16.mxu1 %v1744_v46  ;;  %1781 = vmatprep.subr.bf16.mxu0 %v1780_v38  ;;  %v486_v46 = vld [vmem:[#allocation6 + $0xf0] sm:$0xff]  ;;  %v1188_v37 = vld [vmem:[#allocation12 + $0x8] sm:$0xff] }
  0xd7   :  { %v1786_v49 = vpack.c.bf16 %v486_v46, %v484_v45  ;;  %v514_v45 = vld [vmem:[#allocation6 + $0x1d0] sm:$0xff] }
  0xd9   :  { %1747 = vmatpush1.bf16.msra.mxu1 %v1746_v51  ;;  %1783 = vmatpush1.bf16.msra.mxu0 %v1782_v43  ;;  %v488_v51 = vld [vmem:[#allocation6 + $0x100] sm:$0xff] }
  0xda   :  { %1749 = vmatprep.subr.bf16.mxu1 %v1748_v52  ;;  %1785 = vmatprep.subr.bf16.mxu0 %v1784_v44  ;;  %v490_v52 = vld [vmem:[#allocation6 + $0x110] sm:$0xff]  ;;  %v512_v44 = vld [vmem:[#allocation6 + $0x1c0] sm:$0xff] }
  0xdb   :  { %v1814_v46 = vpack.c.bf16 %v514_v45, %v512_v44  ;;  %v645_v44 = vld [vmem:[#allocation7 + $0x100] sm:$0xff]  ;;  %v647_v45 = vld [vmem:[#allocation7 + $0x110] sm:$0xff] }
  0xdd   :  { %1751 = vmatpush1.bf16.msra.mxu1 %v1750_v55  ;;  %1787 = vmatpush1.bf16.msra.mxu0 %v1786_v49  ;;  %v1790_v55 = vpack.c.bf16 %v490_v52, %v488_v51  ;;  %v1816_v49 = vpack.c.bf16 %v519_v48, %v517_v47  ;;  %v518_v51 = vld [vmem:[#allocation6 + $0x1f0] sm:$0xff]  ;;  %v652_v47 = vld [vmem:[#allocation7 + $0x138] sm:$0xff]  ;;  %v1854_v48 = vpack.c.bf16 %v647_v45, %v645_v44  ;;  %v787_v44 = vld [vmem:[#allocation9 + $0x8] sm:$0xff] }
  0xde   :  { %1753 = vmatprep.subr.bf16.mxu1 %v1752_v58  ;;  %1789 = vmatprep.subr.bf16.mxu0 %v1788_v50  ;;  %v494_v58 = vld [vmem:[#allocation6 + $0x130] sm:$0xff]  ;;  %v516_v50 = vld [vmem:[#allocation6 + $0x1e0] sm:$0xff]  ;;  %v789_v45 = vld [vmem:[#allocation9 + $0x18] sm:$0xff] }
  0xdf   :  { %v1818_v52 = vpack.c.bf16 %v518_v51, %v516_v50  ;;  %v649_v50 = vld [vmem:[#allocation7 + $0x120] sm:$0xff]  ;;  %v651_v51 = vld [vmem:[#allocation7 + $0x130] sm:$0xff] }
  0xe1   :  { %1755 = vmatpush1.bf16.msra.mxu1 %v1754_v61  ;;  %1791 = vmatpush1.bf16.msra.mxu0 %v1790_v55  ;;  %v1794_v61 = vpack.c.bf16 %v494_v58, %v492_v57  ;;  %v613_v55 = vld [vmem:[#allocation7] sm:$0xff]  ;;  %v615_v57 = vld [vmem:[#allocation7 + $0x10] sm:$0xff]  ;;  %v618_v58 = vld [vmem:[#allocation7 + $0x28] sm:$0xff] }
  0xe2   :  { %1793 = vmatprep.subr.bf16.mxu0 %v1792_v56  ;;  %v1820_v56 = vpack.c.bf16 %v616_v54, %v614_v53  ;;  %v1822_v60 = vpack.c.bf16 %v615_v57, %v613_v55  ;;  %v656_v53 = vld [vmem:[#allocation7 + $0x158] sm:$0xff]  ;;  %v1858_v54 = vpack.c.bf16 %v651_v51, %v649_v50  ;;  %v655_v57 = vld [vmem:[#allocation7 + $0x150] sm:$0xff] }
  0xe3   :  { %v793_v50 = vld [vmem:[#allocation9 + $0x38] sm:$0xff] }
  0xe4   :  { %1821 = vmatprep.subr.bf16.mxu1 %v1820_v56  ;;  %v653_v56 = vld [vmem:[#allocation7 + $0x140] sm:$0xff] }
  0xe5   :  { %1795 = vmatpush1.bf16.msra.mxu0 %v1794_v61  ;;  %v1824_v61 = vpack.c.bf16 %v620_v59, %v618_v58  ;;  %v658_v58 = vld [vmem:[#allocation7 + $0x168] sm:$0xff]  ;;  %v660_v59 = vld [vmem:[#allocation7 + $0x178] sm:$0xff] }
  0xe6   :  { %1797 = vmatprep.subr.bf16.mxu0 %v1796_v62  ;;  %v617_v62 = vld [vmem:[#allocation7 + $0x20] sm:$0xff] }
  0xe7   :  { %v1826_v3 = vpack.c.bf16 %v619_v63, %v617_v62  ;;  %v657_v62 = vld [vmem:[#allocation7 + $0x160] sm:$0xff]  ;;  %v659_v63 = vld [vmem:[#allocation7 + $0x170] sm:$0xff] }
  0xe9   :  { %1799 = vmatpush1.bf16.msra.mxu0 %v1798_v4  ;;  %v1828_v4 = vpack.c.bf16 %v624_v2, %v622_v1  ;;  %v662_v1 = vld [vmem:[#allocation7 + $0x188] sm:$0xff]  ;;  %v664_v2 = vld [vmem:[#allocation7 + $0x198] sm:$0xff] }
  0xea   :  { %1801 = vmatprep.subr.bf16.mxu0 %v1800_v5  ;;  %v621_v5 = vld [vmem:[#allocation7 + $0x40] sm:$0xff] }
  0xeb   :  { %v1830_v9 = vpack.c.bf16 %v623_v6, %v621_v5  ;;  %v661_v5 = vld [vmem:[#allocation7 + $0x180] sm:$0xff]  ;;  %v663_v6 = vld [vmem:[#allocation7 + $0x190] sm:$0xff] }
  0xed   :  { %1803 = vmatpush1.bf16.msra.mxu0 %v1802_v10  ;;  %v1832_v10 = vpack.c.bf16 %v628_v8, %v626_v7  ;;  %v666_v7 = vld [vmem:[#allocation7 + $0x1a8] sm:$0xff]  ;;  %v668_v8 = vld [vmem:[#allocation7 + $0x1b8] sm:$0xff] }
  0xee   :  { %1805 = vmatprep.subr.bf16.mxu0 %v1804_v11  ;;  %v625_v11 = vld [vmem:[#allocation7 + $0x60] sm:$0xff] }
  0xef   :  { %v1834_v15 = vpack.c.bf16 %v627_v12, %v625_v11  ;;  %v665_v11 = vld [vmem:[#allocation7 + $0x1a0] sm:$0xff]  ;;  %v667_v12 = vld [vmem:[#allocation7 + $0x1b0] sm:$0xff] }
  0xf1   :  { %1807 = vmatpush1.bf16.msra.mxu0 %v1806_v16  ;;  %v1836_v16 = vpack.c.bf16 %v632_v14, %v630_v13  ;;  %v670_v13 = vld [vmem:[#allocation7 + $0x1c8] sm:$0xff]  ;;  %v672_v14 = vld [vmem:[#allocation7 + $0x1d8] sm:$0xff] }
  0xf2   :  { %1809 = vmatprep.subr.bf16.mxu0 %v1808_v17  ;;  %v629_v17 = vld [vmem:[#allocation7 + $0x80] sm:$0xff] }
  0xf3   :  { %v1838_v21 = vpack.c.bf16 %v631_v18, %v629_v17  ;;  %v363_v17 = vld [vmem:[%s2950_s19] sm:$0x3] }
  0xf4   :  { %v368_v18 = vrot.slane %v363_v17, %v2707_v26 }
  0xf5   :  { %1811 = vmatpush1.bf16.msra.mxu0 %v1810_v22  ;;  %v1840_v22 = vpack.c.bf16 %v636_v20, %v634_v19  ;;  %v372_v19 = vrot.slane %v363_v17, %v2712_v28  ;;  %v813_v17 = vld [vmem:[#allocation9 + $0xd8] sm:$0xff] }
  0xf6   :  { %1813 = vmatprep.subr.bf16.mxu0 %v1812_v23  ;;  %v633_v23 = vld [vmem:[#allocation7 + $0xa0] sm:$0xff] }
  0xf9   :  { %1815 = vmatpush1.bf16.msra.mxu0 %v1814_v46  ;;  %v650_v46 = vld [vmem:[#allocation7 + $0x128] sm:$0xff] }
  0xfa   :  { %1817 = vmatprep.subr.bf16.mxu0 %v1816_v49  ;;  %v1856_v49 = vpack.c.bf16 %v652_v47, %v650_v46  ;;  %v786_v46 = vld [vmem:[#allocation9] sm:$0xff]  ;;  %v1884_v47 = vpack.c.bf16 %v789_v45, %v787_v44  ;;  %v829_v44 = vld [vmem:[#allocation9 + $0x158] sm:$0xff] }
  0xfd   :  { %1819 = vmatpush1.bf16.msra.mxu0 %v1818_v52  ;;  %v654_v52 = vld [vmem:[#allocation7 + $0x148] sm:$0xff] }
  0xfe   :  { %v1860_v55 = vpack.c.bf16 %v656_v53, %v654_v52  ;;  %v790_v53 = vld [vmem:[#allocation9 + $0x20] sm:$0xff]  ;;  %1885 = vmatprep.subr.bf16.mxu0 %v1884_v47 }
  0xff   :  { %v826_v47 = vld [vmem:[#allocation9 + $0x140] sm:$0xff] }
 0x18d   :  { %v284_v31 = vpop.f32.mrb[0].mxu0 }
 0x18e   :  { %v285_v32 = vadd.f32 %v284_v31, %v197_v29  ;;  %v286_v33 = vpop.f32.mrb[1].mxu0  ;;  %v637_v31 = vld [vmem:[#allocation7 + $0xc0] sm:$0xff] }
 0x18f   :  { %v287_v34 = vadd.f32 %v286_v33, %v201_v30  ;;  %v642_v33 = vld [vmem:[#allocation7 + $0xe8] sm:$0xff] }
 0x190   :  { %v295_v38 = vmax.f32 %v285_v32, 0.0  ;;  %v639_v32 = vld [vmem:[#allocation7 + $0xd0] sm:$0xff] }
 0x191   :  { %v290_v35 = vpop.f32.mrb[2].mxu0  ;;  %v296_v36 = vmax.f32 %v287_v34, 0.0  ;;  %v644_v34 = vld [vmem:[#allocation7 + $0xf8] sm:$0xff] }
 0x192   :  { %v291_v39 = vadd.f32 %v290_v35, %v197_v29  ;;  %v292_v40 = vpop.f32.mrb[3].mxu0  ;;  %v1842_v29 = vpack.c.bf16 %v635_v24, %v633_v23  ;;  %v1846_v35 = vpack.c.bf16 %v639_v32, %v637_v31 }
 0x193   :  { %v293_v41 = vadd.f32 %v292_v40, %v201_v30  ;;  %439 = vmatprep.mubr.f32.mxu1 %v296_v36  ;;  %v1844_v30 = vpack.c.bf16 %v640_v27, %v638_v25  ;;  %v1848_v36 = vpack.c.bf16 %v644_v34, %v642_v33  ;;  %v646_v40 = vld [vmem:[#allocation7 + $0x108] sm:$0xff]  ;;  %v669_v34 = vld [vmem:[#allocation7 + $0x1c0] sm:$0xff] }
 0x194   :  { %v297_v42 = vmax.f32 %v291_v39, 0.0  ;;  %440 = vmatmul.mubr.f32.vlgmr.msra.gmra.mrb[0].mxu1 %v295_v38  ;;  %v641_v38 = vld [vmem:[#allocation7 + $0xe0] sm:$0xff]  ;;  %v643_v39 = vld [vmem:[#allocation7 + $0xf0] sm:$0xff] }
 0x195   :  { %v298_v43 = vmax.f32 %v293_v41, 0.0  ;;  %1823 = vmatpush1.bf16.msra.mxu1 %v1822_v60  ;;  %v648_v41 = vld [vmem:[#allocation7 + $0x118] sm:$0xff]  ;;  %v1862_v60 = vpack.c.bf16 %v655_v57, %v653_v56 }
 0x196   :  { %1825 = vmatprep.subr.bf16.mxu1 %v1824_v61  ;;  %v1864_v61 = vpack.c.bf16 %v660_v59, %v658_v58  ;;  %v797_v56 = vld [vmem:[#allocation9 + $0x58] sm:$0xff]  ;;  %v794_v59 = vld [vmem:[#allocation9 + $0x40] sm:$0xff] }
 0x197   :  { %445 = vmatprep.mubr.f32.mxu1 %v298_v43  ;;  %v1852_v43 = vpack.c.bf16 %v648_v41, %v646_v40  ;;  %v673_v41 = vld [vmem:[#allocation7 + $0x1e0] sm:$0xff] }
 0x198   :  { %446 = vmatmul.mubr.f32.gmra.mrb[2].mxu1 %v297_v42  ;;  %v1850_v42 = vpack.c.bf16 %v643_v39, %v641_v38  ;;  %v674_v38 = vld [vmem:[#allocation7 + $0x1e8] sm:$0xff]  ;;  %v676_v39 = vld [vmem:[#allocation7 + $0x1f8] sm:$0xff] }
 0x199   :  { %1827 = vmatpush1.bf16.msra.mxu1 %v1826_v3  ;;  %v1866_v3 = vpack.c.bf16 %v659_v63, %v657_v62  ;;  %v1880_v40 = vpack.c.bf16 %v676_v39, %v674_v38  ;;  %v801_v62 = vld [vmem:[#allocation9 + $0x78] sm:$0xff] }
 0x19a   :  { %1829 = vmatprep.subr.bf16.mxu1 %v1828_v4  ;;  %v1868_v4 = vpack.c.bf16 %v664_v2, %v662_v1  ;;  %v798_v2 = vld [vmem:[#allocation9 + $0x60] sm:$0xff]  ;;  %v825_v38 = vld [vmem:[#allocation9 + $0x138] sm:$0xff] }
 0x19d   :  { %1831 = vmatpush1.bf16.msra.mxu1 %v1830_v9  ;;  %v1870_v9 = vpack.c.bf16 %v663_v6, %v661_v5  ;;  %v805_v5 = vld [vmem:[#allocation9 + $0x98] sm:$0xff] }
 0x19e   :  { %1833 = vmatprep.subr.bf16.mxu1 %v1832_v10  ;;  %v1872_v10 = vpack.c.bf16 %v668_v8, %v666_v7  ;;  %v802_v8 = vld [vmem:[#allocation9 + $0x80] sm:$0xff] }
 0x1a1   :  { %1835 = vmatpush1.bf16.msra.mxu1 %v1834_v15  ;;  %v1874_v15 = vpack.c.bf16 %v667_v12, %v665_v11  ;;  %v809_v11 = vld [vmem:[#allocation9 + $0xb8] sm:$0xff] }
 0x1a2   :  { %1837 = vmatprep.subr.bf16.mxu1 %v1836_v16  ;;  %v1876_v16 = vpack.c.bf16 %v672_v14, %v670_v13  ;;  %v806_v14 = vld [vmem:[#allocation9 + $0xa0] sm:$0xff] }
 0x1a5   :  { %1839 = vmatpush1.bf16.msra.mxu1 %v1838_v21 }
 0x1a6   :  { %1841 = vmatprep.subr.bf16.mxu1 %v1840_v22 }
 0x1a9   :  { %1843 = vmatpush1.bf16.msra.mxu1 %v1842_v29 }
 0x1aa   :  { %1845 = vmatprep.subr.bf16.mxu1 %v1844_v30 }
 0x1ad   :  { %1847 = vmatpush1.bf16.msra.mxu1 %v1846_v35  ;;  %v671_v35 = vld [vmem:[#allocation7 + $0x1d0] sm:$0xff] }
 0x1ae   :  { %1849 = vmatprep.subr.bf16.mxu1 %v1848_v36  ;;  %v1878_v36 = vpack.c.bf16 %v671_v35, %v669_v34  ;;  %v818_v34 = vld [vmem:[#allocation9 + $0x100] sm:$0xff]  ;;  %v820_v35 = vld [vmem:[#allocation9 + $0x110] sm:$0xff] }
 0x1af   :  { %v1918_v39 = vpack.c.bf16 %v820_v35, %v818_v34  ;;  %v771_v34 = vld [vmem:[%s2921_s9 + $0x8] sm:$0xff]  ;;  %v773_v35 = vld [vmem:[%s2921_s9 + $0x18] sm:$0xff] }
 0x1b1   :  { %1851 = vmatpush1.bf16.msra.mxu1 %v1850_v42  ;;  %v675_v42 = vld [vmem:[#allocation7 + $0x1f0] sm:$0xff] }
 0x1b2   :  { %1853 = vmatprep.subr.bf16.mxu1 %v1852_v43  ;;  %v1882_v43 = vpack.c.bf16 %v675_v42, %v673_v41  ;;  %v822_v41 = vld [vmem:[#allocation9 + $0x120] sm:$0xff]  ;;  %v824_v42 = vld [vmem:[#allocation9 + $0x130] sm:$0xff] }
 0x1b3   :  { %v1922_v45 = vpack.c.bf16 %v824_v42, %v822_v41  ;;  %v1032_v42 = vld [vmem:[#allocation10 + $0x10] sm:$0xff] }
 0x1b5   :  { %1855 = vmatpush1.bf16.msra.mxu1 %v1854_v48  ;;  %v788_v48 = vld [vmem:[#allocation9 + $0x10] sm:$0xff] }
 0x1b6   :  { %1857 = vmatprep.subr.bf16.mxu1 %v1856_v49  ;;  %v791_v49 = vld [vmem:[#allocation9 + $0x28] sm:$0xff]  ;;  %v1886_v51 = vpack.c.bf16 %v788_v48, %v786_v46  ;;  %v828_v48 = vld [vmem:[#allocation9 + $0x150] sm:$0xff] }
 0x1b7   :  { %v1888_v52 = vpack.c.bf16 %v793_v50, %v791_v49  ;;  %v831_v49 = vld [vmem:[#allocation9 + $0x168] sm:$0xff]  ;;  %v833_v50 = vld [vmem:[#allocation9 + $0x178] sm:$0xff] }
 0x1b9   :  { %1859 = vmatpush1.bf16.msra.mxu1 %v1858_v54  ;;  %v792_v54 = vld [vmem:[#allocation9 + $0x30] sm:$0xff] }
 0x1ba   :  { %1861 = vmatprep.subr.bf16.mxu1 %v1860_v55  ;;  %v795_v55 = vld [vmem:[#allocation9 + $0x48] sm:$0xff]  ;;  %v1890_v57 = vpack.c.bf16 %v792_v54, %v790_v53  ;;  %v830_v53 = vld [vmem:[#allocation9 + $0x160] sm:$0xff]  ;;  %v832_v54 = vld [vmem:[#allocation9 + $0x170] sm:$0xff] }
 0x1bb   :  { %v1892_v58 = vpack.c.bf16 %v797_v56, %v795_v55  ;;  %v835_v55 = vld [vmem:[#allocation9 + $0x188] sm:$0xff]  ;;  %v837_v56 = vld [vmem:[#allocation9 + $0x198] sm:$0xff] }
 0x1bd   :  { %1863 = vmatpush1.bf16.msra.mxu1 %v1862_v60  ;;  %v796_v60 = vld [vmem:[#allocation9 + $0x50] sm:$0xff] }
 0x1be   :  { %1865 = vmatprep.subr.bf16.mxu1 %v1864_v61  ;;  %v799_v61 = vld [vmem:[#allocation9 + $0x68] sm:$0xff]  ;;  %v1894_v63 = vpack.c.bf16 %v796_v60, %v794_v59  ;;  %v834_v59 = vld [vmem:[#allocation9 + $0x180] sm:$0xff]  ;;  %v836_v60 = vld [vmem:[#allocation9 + $0x190] sm:$0xff] }
 0x1bf   :  { %v1896_v1 = vpack.c.bf16 %v801_v62, %v799_v61  ;;  %v839_v61 = vld [vmem:[#allocation9 + $0x1a8] sm:$0xff]  ;;  %v841_v62 = vld [vmem:[#allocation9 + $0x1b8] sm:$0xff] }
 0x1c1   :  { %1867 = vmatpush1.bf16.msra.mxu1 %v1866_v3  ;;  %v800_v3 = vld [vmem:[#allocation9 + $0x70] sm:$0xff] }
 0x1c2   :  { %1869 = vmatprep.subr.bf16.mxu1 %v1868_v4  ;;  %v803_v4 = vld [vmem:[#allocation9 + $0x88] sm:$0xff]  ;;  %v1898_v6 = vpack.c.bf16 %v800_v3, %v798_v2  ;;  %v838_v2 = vld [vmem:[#allocation9 + $0x1a0] sm:$0xff]  ;;  %v840_v3 = vld [vmem:[#allocation9 + $0x1b0] sm:$0xff] }
 0x1c3   :  { %v1900_v7 = vpack.c.bf16 %v805_v5, %v803_v4  ;;  %v843_v4 = vld [vmem:[#allocation9 + $0x1c8] sm:$0xff]  ;;  %v845_v5 = vld [vmem:[#allocation9 + $0x1d8] sm:$0xff] }
 0x1c5   :  { %1871 = vmatpush1.bf16.msra.mxu1 %v1870_v9  ;;  %v804_v9 = vld [vmem:[#allocation9 + $0x90] sm:$0xff] }
 0x1c6   :  { %1873 = vmatprep.subr.bf16.mxu1 %v1872_v10  ;;  %v807_v10 = vld [vmem:[#allocation9 + $0xa8] sm:$0xff]  ;;  %v1902_v12 = vpack.c.bf16 %v804_v9, %v802_v8  ;;  %v842_v8 = vld [vmem:[#allocation9 + $0x1c0] sm:$0xff]  ;;  %v844_v9 = vld [vmem:[#allocation9 + $0x1d0] sm:$0xff] }
 0x1c7   :  { %v1904_v13 = vpack.c.bf16 %v809_v11, %v807_v10  ;;  %v1942_v10 = vpack.c.bf16 %v844_v9, %v842_v8  ;;  %v520_v11 = vld [vmem:[%s2918_s6] sm:$0x3]  ;;  %v1050_v8 = vld [vmem:[#allocation10 + $0xa0] sm:$0xff] }
 0x1c8   :  { %v1052_v9 = vld [vmem:[#allocation10 + $0xb0] sm:$0xff] }
 0x1c9   :  { %1875 = vmatpush1.bf16.msra.mxu1 %v1874_v15  ;;  %v808_v15 = vld [vmem:[#allocation9 + $0xb0] sm:$0xff] }
 0x1ca   :  { %1877 = vmatprep.subr.bf16.mxu1 %v1876_v16  ;;  %v811_v16 = vld [vmem:[#allocation9 + $0xc8] sm:$0xff] }
 0x1cd   :  { %1879 = vmatpush1.bf16.msra.mxu1 %v1878_v36  ;;  %v823_v36 = vld [vmem:[#allocation9 + $0x128] sm:$0xff] }
 0x1ce   :  { %1881 = vmatprep.subr.bf16.mxu1 %v1880_v40  ;;  %v1920_v40 = vpack.c.bf16 %v825_v38, %v823_v36  ;;  %v1948_v36 = vpack.c.bf16 %v773_v35, %v771_v34  ;;  %v1031_v38 = vld [vmem:[#allocation10 + $0x8] sm:$0xff]  ;;  %v1066_v34 = vld [vmem:[#allocation10 + $0x120] sm:$0xff]  ;;  %v1068_v35 = vld [vmem:[#allocation10 + $0x130] sm:$0xff] }
 0x1d1   :  { %1883 = vmatpush1.bf16.msra.mxu1 %v1882_v43  ;;  %v827_v43 = vld [vmem:[#allocation9 + $0x148] sm:$0xff] }
 0x1d2   :  { %v1924_v46 = vpack.c.bf16 %v829_v44, %v827_v43  ;;  %v1035_v43 = vld [vmem:[#allocation10 + $0x28] sm:$0xff]  ;;  %v1037_v44 = vld [vmem:[#allocation10 + $0x38] sm:$0xff] }
 0x267   :  { %v441_v20 = vpop.f32.mrb[0].mxu1 }
 0x268   :  { %v442_v21 = vadd.f32 %v441_v20, %v368_v18  ;;  %v443_v22 = vpop.f32.mrb[1].mxu1  ;;  %v810_v20 = vld [vmem:[#allocation9 + $0xc0] sm:$0xff] }
 0x269   :  { %v444_v23 = vadd.f32 %v443_v22, %v372_v19  ;;  %v815_v22 = vld [vmem:[#allocation9 + $0xe8] sm:$0xff] }
 0x26a   :  { %v452_v27 = vmax.f32 %v442_v21, 0.0  ;;  %v812_v21 = vld [vmem:[#allocation9 + $0xd0] sm:$0xff] }
 0x26b   :  { %v453_v24 = vmax.f32 %v444_v23, 0.0  ;;  %v447_v25 = vpop.f32.mrb[2].mxu1  ;;  %v817_v23 = vld [vmem:[#allocation9 + $0xf8] sm:$0xff] }
 0x26c   :  { %v448_v29 = vadd.f32 %v447_v25, %v368_v18  ;;  %v449_v30 = vpop.f32.mrb[3].mxu1  ;;  %v1906_v18 = vpack.c.bf16 %v808_v15, %v806_v14  ;;  %v1912_v25 = vpack.c.bf16 %v817_v23, %v815_v22 }
 0x26d   :  { %v450_v31 = vadd.f32 %v449_v30, %v372_v19  ;;  %596 = vmatprep.mubr.f32.mxu0 %v453_v24  ;;  %v1908_v19 = vpack.c.bf16 %v813_v17, %v811_v16  ;;  %v1910_v24 = vpack.c.bf16 %v812_v21, %v810_v20  ;;  %v819_v30 = vld [vmem:[#allocation9 + $0x108] sm:$0xff] }
 0x26e   :  { %v454_v32 = vmax.f32 %v448_v29, 0.0  ;;  %597 = vmatmul.mubr.f32.vlgmr.msra.gmra.mrb[4].mxu0 %v452_v27  ;;  %v814_v27 = vld [vmem:[#allocation9 + $0xe0] sm:$0xff]  ;;  %v816_v29 = vld [vmem:[#allocation9 + $0xf0] sm:$0xff] }
 0x26f   :  { %v455_v33 = vmax.f32 %v450_v31, 0.0  ;;  %1887 = vmatpush1.bf16.msra.mxu0 %v1886_v51  ;;  %v821_v31 = vld [vmem:[#allocation9 + $0x118] sm:$0xff]  ;;  %v1926_v51 = vpack.c.bf16 %v828_v48, %v826_v47  ;;  %v1034_v47 = vld [vmem:[#allocation10 + $0x20] sm:$0xff]  ;;  %v1036_v48 = vld [vmem:[#allocation10 + $0x30] sm:$0xff] }
 0x270   :  { %1889 = vmatprep.subr.bf16.mxu0 %v1888_v52  ;;  %v1928_v52 = vpack.c.bf16 %v833_v50, %v831_v49  ;;  %v1039_v49 = vld [vmem:[#allocation10 + $0x48] sm:$0xff]  ;;  %v1041_v50 = vld [vmem:[#allocation10 + $0x58] sm:$0xff] }
 0x271   :  { %602 = vmatprep.mubr.f32.mxu0 %v455_v33  ;;  %v1916_v33 = vpack.c.bf16 %v821_v31, %v819_v30  ;;  %v846_v31 = vld [vmem:[#allocation9 + $0x1e0] sm:$0xff] }
 0x272   :  { %603 = vmatmul.mubr.f32.gmra.mrb[6].mxu0 %v454_v32  ;;  %v1914_v32 = vpack.c.bf16 %v816_v29, %v814_v27  ;;  %v847_v27 = vld [vmem:[#allocation9 + $0x1e8] sm:$0xff]  ;;  %v849_v29 = vld [vmem:[#allocation9 + $0x1f8] sm:$0xff] }
 0x273   :  { %1891 = vmatpush1.bf16.msra.mxu0 %v1890_v57  ;;  %v1930_v57 = vpack.c.bf16 %v832_v54, %v830_v53  ;;  %v1944_v30 = vpack.c.bf16 %v849_v29, %v847_v27  ;;  %v1038_v53 = vld [vmem:[#allocation10 + $0x40] sm:$0xff]  ;;  %v1040_v54 = vld [vmem:[#allocation10 + $0x50] sm:$0xff] }
 0x274   :  { %1893 = vmatprep.subr.bf16.mxu0 %v1892_v58  ;;  %v1932_v58 = vpack.c.bf16 %v837_v56, %v835_v55  ;;  %v1043_v55 = vld [vmem:[#allocation10 + $0x68] sm:$0xff]  ;;  %v1045_v56 = vld [vmem:[#allocation10 + $0x78] sm:$0xff]  ;;  %v1062_v27 = vld [vmem:[#allocation10 + $0x100] sm:$0xff] }
 0x275   :  { %v1064_v29 = vld [vmem:[#allocation10 + $0x110] sm:$0xff] }
 0x277   :  { %1895 = vmatpush1.bf16.msra.mxu0 %v1894_v63  ;;  %v1934_v63 = vpack.c.bf16 %v836_v60, %v834_v59  ;;  %v1042_v59 = vld [vmem:[#allocation10 + $0x60] sm:$0xff]  ;;  %v1044_v60 = vld [vmem:[#allocation10 + $0x70] sm:$0xff] }
 0x278   :  { %1897 = vmatprep.subr.bf16.mxu0 %v1896_v1  ;;  %v1936_v1 = vpack.c.bf16 %v841_v62, %v839_v61  ;;  %v1047_v61 = vld [vmem:[#allocation10 + $0x88] sm:$0xff]  ;;  %v1049_v62 = vld [vmem:[#allocation10 + $0x98] sm:$0xff] }
 0x27b   :  { %1899 = vmatpush1.bf16.msra.mxu0 %v1898_v6  ;;  %v1938_v6 = vpack.c.bf16 %v840_v3, %v838_v2  ;;  %v1046_v2 = vld [vmem:[#allocation10 + $0x80] sm:$0xff]  ;;  %v1048_v3 = vld [vmem:[#allocation10 + $0x90] sm:$0xff] }
 0x27c   :  { %1901 = vmatprep.subr.bf16.mxu0 %v1900_v7  ;;  %v1940_v7 = vpack.c.bf16 %v845_v5, %v843_v4  ;;  %v1051_v4 = vld [vmem:[#allocation10 + $0xa8] sm:$0xff]  ;;  %v1053_v5 = vld [vmem:[#allocation10 + $0xb8] sm:$0xff] }
 0x27f   :  { %1903 = vmatpush1.bf16.msra.mxu0 %v1902_v12  ;;  %v525_v12 = vrot.slane %v520_v11, %v2707_v26 }
 0x280   :  { %1905 = vmatprep.subr.bf16.mxu0 %v1904_v13  ;;  %v529_v13 = vrot.slane %v520_v11, %v2712_v28  ;;  %v1057_v11 = vld [vmem:[#allocation10 + $0xd8] sm:$0xff] }
 0x283   :  { %1907 = vmatpush1.bf16.msra.mxu0 %v1906_v18 }
 0x284   :  { %1909 = vmatprep.subr.bf16.mxu0 %v1908_v19 }
 0x287   :  { %1911 = vmatpush1.bf16.msra.mxu0 %v1910_v24 }
 0x288   :  { %1913 = vmatprep.subr.bf16.mxu0 %v1912_v25 }
 0x28b   :  { %1915 = vmatpush1.bf16.msra.mxu0 %v1914_v32  ;;  %v848_v32 = vld [vmem:[#allocation9 + $0x1f0] sm:$0xff] }
 0x28c   :  { %1917 = vmatprep.subr.bf16.mxu0 %v1916_v33  ;;  %v1946_v33 = vpack.c.bf16 %v848_v32, %v846_v31  ;;  %v1069_v31 = vld [vmem:[#allocation10 + $0x138] sm:$0xff]  ;;  %v2000_v32 = vpack.c.bf16 %v1064_v29, %v1062_v27 }
 0x28f   :  { %1919 = vmatpush1.bf16.msra.mxu0 %v1918_v39  ;;  %v1033_v39 = vld [vmem:[#allocation10 + $0x18] sm:$0xff] }
 0x290   :  { %1921 = vmatprep.subr.bf16.mxu0 %v1920_v40  ;;  %v1030_v40 = vld [vmem:[#allocation10] sm:$0xff]  ;;  %v1966_v41 = vpack.c.bf16 %v1033_v39, %v1031_v38  ;;  %v1073_v38 = vld [vmem:[#allocation10 + $0x158] sm:$0xff]  ;;  %v2004_v39 = vpack.c.bf16 %v1068_v35, %v1066_v34  ;;  %v785_v34 = vld [vmem:[%s2921_s9 + $0x78] sm:$0x7f] }
 0x292   :  { %1967 = vmatprep.subr.bf16.mxu1 %v1966_v41  ;;  %v1070_v41 = vld [vmem:[#allocation10 + $0x140] sm:$0xff] }
 0x293   :  { %1923 = vmatpush1.bf16.msra.mxu0 %v1922_v45  ;;  %v1968_v45 = vpack.c.bf16 %v1032_v42, %v1030_v40  ;;  %v1072_v42 = vld [vmem:[#allocation10 + $0x150] sm:$0xff] }
 0x294   :  { %1925 = vmatprep.subr.bf16.mxu0 %v1924_v46  ;;  %v1970_v46 = vpack.c.bf16 %v1037_v44, %v1035_v43  ;;  %v1075_v43 = vld [vmem:[#allocation10 + $0x168] sm:$0xff]  ;;  %v1077_v44 = vld [vmem:[#allocation10 + $0x178] sm:$0xff] }
 0x297   :  { %1927 = vmatpush1.bf16.msra.mxu0 %v1926_v51  ;;  %v1972_v51 = vpack.c.bf16 %v1036_v48, %v1034_v47  ;;  %v1074_v47 = vld [vmem:[#allocation10 + $0x160] sm:$0xff]  ;;  %v1076_v48 = vld [vmem:[#allocation10 + $0x170] sm:$0xff] }
 0x298   :  { %1929 = vmatprep.subr.bf16.mxu0 %v1928_v52  ;;  %v1974_v52 = vpack.c.bf16 %v1041_v50, %v1039_v49  ;;  %v1079_v49 = vld [vmem:[#allocation10 + $0x188] sm:$0xff]  ;;  %v1081_v50 = vld [vmem:[#allocation10 + $0x198] sm:$0xff] }
 0x29b   :  { %1931 = vmatpush1.bf16.msra.mxu0 %v1930_v57  ;;  %v1976_v57 = vpack.c.bf16 %v1040_v54, %v1038_v53  ;;  %v1078_v53 = vld [vmem:[#allocation10 + $0x180] sm:$0xff]  ;;  %v1080_v54 = vld [vmem:[#allocation10 + $0x190] sm:$0xff] }
 0x29c   :  { %1933 = vmatprep.subr.bf16.mxu0 %v1932_v58  ;;  %v1978_v58 = vpack.c.bf16 %v1045_v56, %v1043_v55  ;;  %v1083_v55 = vld [vmem:[#allocation10 + $0x1a8] sm:$0xff]  ;;  %v1085_v56 = vld [vmem:[#allocation10 + $0x1b8] sm:$0xff] }
 0x29f   :  { %1935 = vmatpush1.bf16.msra.mxu0 %v1934_v63  ;;  %v1980_v63 = vpack.c.bf16 %v1044_v60, %v1042_v59  ;;  %v1082_v59 = vld [vmem:[#allocation10 + $0x1a0] sm:$0xff]  ;;  %v1084_v60 = vld [vmem:[#allocation10 + $0x1b0] sm:$0xff] }
 0x2a0   :  { %1937 = vmatprep.subr.bf16.mxu0 %v1936_v1  ;;  %v1982_v1 = vpack.c.bf16 %v1049_v62, %v1047_v61  ;;  %v1087_v61 = vld [vmem:[#allocation10 + $0x1c8] sm:$0xff]  ;;  %v1089_v62 = vld [vmem:[#allocation10 + $0x1d8] sm:$0xff] }
 0x2a3   :  { %1939 = vmatpush1.bf16.msra.mxu0 %v1938_v6  ;;  %v1984_v6 = vpack.c.bf16 %v1048_v3, %v1046_v2  ;;  %v677_v2 = vld [vmem:[%s2920_s8] sm:$0x3] }
 0x2a4   :  { %1941 = vmatprep.subr.bf16.mxu0 %v1940_v7  ;;  %v1986_v7 = vpack.c.bf16 %v1053_v5, %v1051_v4  ;;  %v682_v3 = vrot.slane %v677_v2, %v2707_v26  ;;  %v686_v4 = vrot.slane %v677_v2, %v2712_v28  ;;  %v1195_v2 = vld [vmem:[#allocation12 + $0x40] sm:$0xff] }
 0x2a7   :  { %1943 = vmatpush1.bf16.msra.mxu0 %v1942_v10  ;;  %v1055_v10 = vld [vmem:[#allocation10 + $0xc8] sm:$0xff] }
 0x2a8   :  { %1945 = vmatprep.subr.bf16.mxu0 %v1944_v30  ;;  %v1067_v30 = vld [vmem:[#allocation10 + $0x128] sm:$0xff] }
 0x2ab   :  { %1947 = vmatpush1.bf16.msra.mxu0 %v1946_v33  ;;  %v2002_v33 = vpack.c.bf16 %v1069_v31, %v1067_v30  ;;  %v778_v31 = vld [vmem:[%s2921_s9 + $0x40] sm:$0xff] }
 0x2ac   :  { %1949 = vmatprep.subr.bf16.mxu0 %v1948_v36  ;;  %v1071_v36 = vld [vmem:[#allocation10 + $0x148] sm:$0xff] }
 0x2ad   :  { %v2006_v40 = vpack.c.bf16 %v1073_v38, %v1071_v36  ;;  %v782_v38 = vld [vmem:[%s2921_s9 + $0x60] sm:$0xff] }
 0x341   :  { %v598_v14 = vpop.f32.mrb[4].mxu0 }
 0x342   :  { %v599_v15 = vadd.f32 %v598_v14, %v525_v12  ;;  %v600_v16 = vpop.f32.mrb[5].mxu0  ;;  %v1054_v14 = vld [vmem:[#allocation10 + $0xc0] sm:$0xff] }
 0x343   :  { %v601_v17 = vadd.f32 %v600_v16, %v529_v13  ;;  %v1059_v16 = vld [vmem:[#allocation10 + $0xe8] sm:$0xff] }
 0x344   :  { %v609_v20 = vmax.f32 %v599_v15, 0.0  ;;  %v1056_v15 = vld [vmem:[#allocation10 + $0xd0] sm:$0xff] }
 0x345   :  { %v610_v18 = vmax.f32 %v601_v17, 0.0  ;;  %v604_v19 = vpop.f32.mrb[6].mxu0  ;;  %v1061_v17 = vld [vmem:[#allocation10 + $0xf8] sm:$0xff] }
 0x346   :  { %v605_v21 = vadd.f32 %v604_v19, %v525_v12  ;;  %v606_v22 = vpop.f32.mrb[7].mxu0  ;;  %v1988_v12 = vpack.c.bf16 %v1052_v9, %v1050_v8  ;;  %v1994_v19 = vpack.c.bf16 %v1061_v17, %v1059_v16  ;;  %v770_v8 = vld [vmem:[%s2921_s9] sm:$0xff]  ;;  %v772_v9 = vld [vmem:[%s2921_s9 + $0x10] sm:$0xff] }
 0x347   :  { %v607_v23 = vadd.f32 %v606_v22, %v529_v13  ;;  %753 = vmatprep.mubr.f32.mxu1 %v610_v18  ;;  %v1990_v13 = vpack.c.bf16 %v1057_v11, %v1055_v10  ;;  %v1992_v18 = vpack.c.bf16 %v1056_v15, %v1054_v14  ;;  %v1063_v22 = vld [vmem:[#allocation10 + $0x108] sm:$0xff]  ;;  %v775_v11 = vld [vmem:[%s2921_s9 + $0x28] sm:$0xff]  ;;  %v1950_v15 = vpack.c.bf16 %v772_v9, %v770_v8  ;;  %v1199_v8 = vld [vmem:[#allocation12 + $0x60] sm:$0xff] }
 0x348   :  { %v611_v24 = vmax.f32 %v605_v21, 0.0  ;;  %754 = vmatmul.mubr.f32.vlgmr.msra.gmra.mrb[4].mxu1 %v609_v20  ;;  %v1058_v20 = vld [vmem:[#allocation10 + $0xe0] sm:$0xff]  ;;  %v1060_v21 = vld [vmem:[#allocation10 + $0xf0] sm:$0xff] }
 0x349   :  { %v612_v25 = vmax.f32 %v607_v23, 0.0  ;;  %1969 = vmatpush1.bf16.msra.mxu1 %v1968_v45  ;;  %v1065_v23 = vld [vmem:[#allocation10 + $0x118] sm:$0xff]  ;;  %v2008_v45 = vpack.c.bf16 %v1072_v42, %v1070_v41  ;;  %v2208_v41 = vld [vmem:[#allocation2] sm:$0xff] }
 0x34a   :  { %1971 = vmatprep.subr.bf16.mxu1 %v1970_v46  ;;  %v2010_v46 = vpack.c.bf16 %v1077_v44, %v1075_v43  ;;  %v2209_v42 = vld [vmem:[#allocation2 + $0x8] sm:$0xff]  ;;  %v1086_v43 = vld [vmem:[#allocation10 + $0x1c0] sm:$0xff]  ;;  %v1088_v44 = vld [vmem:[#allocation10 + $0x1d0] sm:$0xff] }
 0x34b   :  { %759 = vmatprep.mubr.f32.mxu1 %v612_v25  ;;  %v1998_v25 = vpack.c.bf16 %v1065_v23, %v1063_v22  ;;  %v779_v23 = vld [vmem:[%s2921_s9 + $0x48] sm:$0xff]  ;;  %v1201_v9 = vld [vmem:[#allocation12 + $0x70] sm:$0xff] }
 0x34c   :  { %760 = vmatmul.mubr.f32.gmra.mrb[6].mxu1 %v611_v24  ;;  %v1996_v24 = vpack.c.bf16 %v1060_v21, %v1058_v20  ;;  %v774_v20 = vld [vmem:[%s2921_s9 + $0x20] sm:$0xff]  ;;  %v776_v21 = vld [vmem:[%s2921_s9 + $0x30] sm:$0xff] }
 0x34d   :  { %1973 = vmatpush1.bf16.msra.mxu1 %v1972_v51  ;;  %v2012_v51 = vpack.c.bf16 %v1076_v48, %v1074_v47  ;;  %v1954_v29 = vpack.c.bf16 %v776_v21, %v774_v20  ;;  %v1093_v47 = vld [vmem:[#allocation10 + $0x1f8] sm:$0xff]  ;;  %v1207_v20 = vld [vmem:[#allocation12 + $0xa0] sm:$0xff]  ;;  %v1209_v21 = vld [vmem:[#allocation12 + $0xb0] sm:$0xff] }
 0x34e   :  { %1975 = vmatprep.subr.bf16.mxu1 %v1974_v52  ;;  %v2014_v52 = vpack.c.bf16 %v1081_v50, %v1079_v49  ;;  %v1090_v49 = vld [vmem:[#allocation10 + $0x1e0] sm:$0xff]  ;;  %v1092_v50 = vld [vmem:[#allocation10 + $0x1f0] sm:$0xff] }
 0x351   :  { %1977 = vmatpush1.bf16.msra.mxu1 %v1976_v57  ;;  %v2016_v57 = vpack.c.bf16 %v1080_v54, %v1078_v53  ;;  %v1187_v53 = vld [vmem:[#allocation12] sm:$0xff] }
 0x352   :  { %1979 = vmatprep.subr.bf16.mxu1 %v1978_v58  ;;  %v2018_v58 = vpack.c.bf16 %v1085_v56, %v1083_v55  ;;  %v1192_v55 = vld [vmem:[#allocation12 + $0x28] sm:$0xff]  ;;  %v1194_v56 = vld [vmem:[#allocation12 + $0x38] sm:$0xff] }
 0x355   :  { %1981 = vmatpush1.bf16.msra.mxu1 %v1980_v63  ;;  %v2020_v63 = vpack.c.bf16 %v1084_v60, %v1082_v59  ;;  %v1191_v59 = vld [vmem:[#allocation12 + $0x20] sm:$0xff]  ;;  %v1193_v60 = vld [vmem:[#allocation12 + $0x30] sm:$0xff] }
 0x356   :  { %1983 = vmatprep.subr.bf16.mxu1 %v1982_v1  ;;  %v2022_v1 = vpack.c.bf16 %v1089_v62, %v1087_v61  ;;  %v1196_v61 = vld [vmem:[#allocation12 + $0x48] sm:$0xff]  ;;  %v1198_v62 = vld [vmem:[#allocation12 + $0x58] sm:$0xff] }
 0x359   :  { %1985 = vmatpush1.bf16.msra.mxu1 %v1984_v6 }
 0x35a   :  { %1987 = vmatprep.subr.bf16.mxu1 %v1986_v7 }
 0x35d   :  { %1989 = vmatpush1.bf16.msra.mxu1 %v1988_v12  ;;  %v777_v12 = vld [vmem:[%s2921_s9 + $0x38] sm:$0xff] }
 0x35e   :  { %1991 = vmatprep.subr.bf16.mxu1 %v1990_v13 }
 0x361   :  { %1993 = vmatpush1.bf16.msra.mxu1 %v1992_v18 }
 0x362   :  { %1995 = vmatprep.subr.bf16.mxu1 %v1994_v19  ;;  %v1952_v19 = vpack.c.bf16 %v777_v12, %v775_v11  ;;  %v1206_v11 = vld [vmem:[#allocation12 + $0x98] sm:$0xff]  ;;  %v2044_v12 = vpack.c.bf16 %v1201_v9, %v1199_v8  ;;  %v1244_v8 = vld [vmem:[#allocation12 + $0x1c8] sm:$0xff] }
 0x363   :  { %v1246_v9 = vld [vmem:[#allocation12 + $0x1d8] sm:$0xff] }
 0x365   :  { %1997 = vmatpush1.bf16.msra.mxu1 %v1996_v24  ;;  %v781_v24 = vld [vmem:[%s2921_s9 + $0x58] sm:$0xff] }
 0x366   :  { %1999 = vmatprep.subr.bf16.mxu1 %v1998_v25  ;;  %v1956_v30 = vpack.c.bf16 %v781_v24, %v779_v23  ;;  %v1214_v23 = vld [vmem:[#allocation12 + $0xd8] sm:$0xff]  ;;  %v2052_v24 = vpack.c.bf16 %v1209_v21, %v1207_v20 }
 0x369   :  { %2001 = vmatpush1.bf16.msra.mxu1 %v2000_v32  ;;  %v780_v32 = vld [vmem:[%s2921_s9 + $0x50] sm:$0xff] }
 0x36a   :  { %2003 = vmatprep.subr.bf16.mxu1 %v2002_v33  ;;  %v783_v33 = vld [vmem:[%s2921_s9 + $0x68] sm:$0xff]  ;;  %v1958_v35 = vpack.c.bf16 %v780_v32, %v778_v31 }
 0x36b   :  { %v1960_v36 = vpack.c.bf16 %v785_v34, %v783_v33  ;;  %v1218_v31 = vld [vmem:[#allocation12 + $0xf8] sm:$0xff]  ;;  %v1215_v34 = vld [vmem:[#allocation12 + $0xe0] sm:$0xff] }
 0x36d   :  { %2005 = vmatpush1.bf16.msra.mxu1 %v2004_v39  ;;  %v784_v39 = vld [vmem:[%s2921_s9 + $0x70] sm:$0x7f] }
 0x36e   :  { %2007 = vmatprep.subr.bf16.mxu1 %v2006_v40  ;;  %v1963_v40 = vpack.c.bf16 %v784_v39, %v782_v38  ;;  %v1222_v38 = vld [vmem:[#allocation12 + $0x118] sm:$0xff] }
 0x371   :  { %2009 = vmatpush1.bf16.msra.mxu1 %v2008_v45  ;;  %v2024_v45 = vpack.c.bf16 %v1088_v44, %v1086_v43  ;;  %v1224_v43 = vld [vmem:[#allocation12 + $0x128] sm:$0xff]  ;;  %v1226_v44 = vld [vmem:[#allocation12 + $0x138] sm:$0xff] }
 0x372   :  { %2011 = vmatprep.subr.bf16.mxu1 %v2010_v46  ;;  %v1091_v46 = vld [vmem:[#allocation10 + $0x1e8] sm:$0xff] }
 0x373   :  { %v2026_v48 = vpack.c.bf16 %v1093_v47, %v1091_v46  ;;  %v2066_v46 = vpack.c.bf16 %v1226_v44, %v1224_v43  ;;  %v1223_v47 = vld [vmem:[#allocation12 + $0x120] sm:$0xff]  ;;  %v1346_v43 = vld [vmem:[#allocation13 + $0x10] sm:$0xff]  ;;  %v1349_v44 = vld [vmem:[#allocation13 + $0x28] sm:$0xff] }
 0x375   :  { %2013 = vmatpush1.bf16.msra.mxu1 %v2012_v51  ;;  %v2028_v51 = vpack.c.bf16 %v1092_v50, %v1090_v49  ;;  %v1228_v49 = vld [vmem:[#allocation12 + $0x148] sm:$0xff]  ;;  %v1230_v50 = vld [vmem:[#allocation12 + $0x158] sm:$0xff] }
 0x376   :  { %2015 = vmatprep.subr.bf16.mxu1 %v2014_v52  ;;  %v1190_v52 = vld [vmem:[#allocation12 + $0x18] sm:$0xff] }
 0x377   :  { %v2030_v54 = vpack.c.bf16 %v1190_v52, %v1188_v37  ;;  %v2070_v37 = vpack.c.bf16 %v1230_v50, %v1228_v49  ;;  %v1227_v52 = vld [vmem:[#allocation12 + $0x140] sm:$0xff]  ;;  %v1350_v49 = vld [vmem:[#allocation13 + $0x30] sm:$0xff]  ;;  %v1353_v50 = vld [vmem:[#allocation13 + $0x48] sm:$0xff] }
 0x379   :  { %2017 = vmatpush1.bf16.msra.mxu1 %v2016_v57 }
 0x37a   :  { %2019 = vmatprep.subr.bf16.mxu1 %v2018_v58  ;;  %v2034_v58 = vpack.c.bf16 %v1194_v56, %v1192_v55 }
 0x37d   :  { %2021 = vmatpush1.bf16.msra.mxu1 %v2020_v63  ;;  %v2036_v63 = vpack.c.bf16 %v1193_v60, %v1191_v59  ;;  %v1236_v59 = vld [vmem:[#allocation12 + $0x188] sm:$0xff]  ;;  %v1238_v60 = vld [vmem:[#allocation12 + $0x198] sm:$0xff] }
 0x37e   :  { %2023 = vmatprep.subr.bf16.mxu1 %v2022_v1  ;;  %v2038_v1 = vpack.c.bf16 %v1198_v62, %v1196_v61  ;;  %v2078_v62 = vpack.c.bf16 %v1238_v60, %v1236_v59  ;;  %v1358_v59 = vld [vmem:[#allocation13 + $0x70] sm:$0xff]  ;;  %v1361_v60 = vld [vmem:[#allocation13 + $0x88] sm:$0xff] }
 0x381   :  { %2025 = vmatpush1.bf16.msra.mxu1 %v2024_v45 }
 0x382   :  { %2027 = vmatprep.subr.bf16.mxu1 %v2026_v48  ;;  %v1225_v48 = vld [vmem:[#allocation12 + $0x130] sm:$0xff] }
 0x385   :  { %2029 = vmatpush1.bf16.msra.mxu1 %v2028_v51  ;;  %v2068_v51 = vpack.c.bf16 %v1225_v48, %v1223_v47  ;;  %v1348_v48 = vld [vmem:[#allocation13 + $0x20] sm:$0xff] }
 0x41b   :  { %v755_v5 = vpop.f32.mrb[4].mxu1 }
 0x41c   :  { %v756_v6 = vadd.f32 %v755_v5, %v682_v3  ;;  %v757_v7 = vpop.f32.mrb[5].mxu1  ;;  %v1202_v5 = vld [vmem:[#allocation12 + $0x78] sm:$0xff] }
 0x41d   :  { %v758_v10 = vadd.f32 %v757_v7, %v686_v4 }
 0x41e   :  { %v766_v16 = vmax.f32 %v756_v6, 0.0 }
 0x41f   :  { %v767_v13 = vmax.f32 %v758_v10, 0.0  ;;  %v761_v14 = vpop.f32.mrb[6].mxu1  ;;  %v1204_v10 = vld [vmem:[#allocation12 + $0x88] sm:$0xff] }
 0x420   :  { %v762_v17 = vadd.f32 %v761_v14, %v682_v3  ;;  %v763_v18 = vpop.f32.mrb[7].mxu1  ;;  %v1197_v3 = vld [vmem:[#allocation12 + $0x50] sm:$0xff]  ;;  %v1203_v14 = vld [vmem:[#allocation12 + $0x80] sm:$0xff] }
 0x421   :  { %v764_v22 = vadd.f32 %v763_v18, %v686_v4  ;;  %914 = vmatprep.mubr.f32.mxu0 %v767_v13  ;;  %v1200_v4 = vld [vmem:[#allocation12 + $0x68] sm:$0xff]  ;;  %v2040_v6 = vpack.c.bf16 %v1197_v3, %v1195_v2  ;;  %v2046_v13 = vpack.c.bf16 %v1206_v11, %v1204_v10  ;;  %v1242_v3 = vld [vmem:[#allocation12 + $0x1b8] sm:$0xff]  ;;  %v2086_v11 = vpack.c.bf16 %v1246_v9, %v1244_v8  ;;  %v1366_v8 = vld [vmem:[#allocation13 + $0xb0] sm:$0xff] }
 0x422   :  { %v768_v25 = vmax.f32 %v762_v17, 0.0  ;;  %915 = vmatmul.mubr.f32.vlgmr.msra.gmra.mrb[8].mxu0 %v766_v16  ;;  %v2042_v7 = vpack.c.bf16 %v1202_v5, %v1200_v4  ;;  %v1208_v16 = vld [vmem:[#allocation12 + $0xa8] sm:$0xff]  ;;  %v1210_v17 = vld [vmem:[#allocation12 + $0xb8] sm:$0xff] }
 0x423   :  { %v769_v27 = vmax.f32 %v764_v22, 0.0  ;;  %1951 = vmatpush1.bf16.msra.mxu0 %v1950_v15  ;;  %v1205_v15 = vld [vmem:[#allocation12 + $0x90] sm:$0xff]  ;;  %v1212_v22 = vld [vmem:[#allocation12 + $0xc8] sm:$0xff] }
 0x424   :  { %1953 = vmatprep.subr.bf16.mxu0 %v1952_v19  ;;  %v2048_v18 = vpack.c.bf16 %v1205_v15, %v1203_v14  ;;  %v2050_v19 = vpack.c.bf16 %v1210_v17, %v1208_v16  ;;  %v1240_v2 = vld [vmem:[#allocation12 + $0x1a8] sm:$0xff] }
 0x425   :  { %920 = vmatprep.mubr.f32.mxu0 %v769_v27  ;;  %v1211_v27 = vld [vmem:[#allocation12 + $0xc0] sm:$0xff]  ;;  %v2082_v5 = vpack.c.bf16 %v1242_v3, %v1240_v2  ;;  %v1362_v2 = vld [vmem:[#allocation13 + $0x90] sm:$0xff]  ;;  %v1365_v3 = vld [vmem:[#allocation13 + $0xa8] sm:$0xff] }
 0x426   :  { %921 = vmatmul.mubr.f32.gmra.mrb[10].mxu0 %v768_v25  ;;  %v2054_v25 = vpack.c.bf16 %v1214_v23, %v1212_v22  ;;  %v1369_v9 = vld [vmem:[#allocation13 + $0xc8] sm:$0xff] }
 0x427   :  { %1955 = vmatpush1.bf16.msra.mxu0 %v1954_v29  ;;  %997 = vmatprep.mubr.f32.mxu0 %v2408_v0  ;;  %v1213_v29 = vld [vmem:[#allocation12 + $0xd0] sm:$0xff] }
 0x428   :  { %1957 = vmatprep.subr.bf16.mxu0 %v1956_v30  ;;  %v1216_v30 = vld [vmem:[#allocation12 + $0xe8] sm:$0xff]  ;;  %v2056_v32 = vpack.c.bf16 %v1213_v29, %v1211_v27  ;;  %v1243_v29 = vld [vmem:[#allocation12 + $0x1c0] sm:$0xff] }
 0x429   :  { %v2058_v33 = vpack.c.bf16 %v1218_v31, %v1216_v30  ;;  %v1245_v30 = vld [vmem:[#allocation12 + $0x1d0] sm:$0xff] }
 0x42a   :  { %v2088_v31 = vpack.c.bf16 %v1245_v30, %v1243_v29  ;;  %v1381_v29 = vld [vmem:[#allocation13 + $0x128] sm:$0xff]  ;;  %v1383_v30 = vld [vmem:[#allocation13 + $0x138] sm:$0xff] }
 0x42b   :  { %1959 = vmatpush1.bf16.msra.mxu0 %v1958_v35  ;;  %v1217_v35 = vld [vmem:[#allocation12 + $0xf0] sm:$0xff] }
 0x42c   :  { %1962 = vmatprep.subr.msk.bf16.mxu0 %vm2696_vm2, %v1960_v36  ;;  %v1220_v36 = vld [vmem:[#allocation12 + $0x108] sm:$0xff]  ;;  %v2060_v39 = vpack.c.bf16 %v1217_v35, %v1215_v34  ;;  %v1247_v35 = vld [vmem:[#allocation12 + $0x1e0] sm:$0xff] }
 0x42f   :  { %1965 = vmatpush1.bf16.msk.msra.mxu0 %vm2696_vm2, %v1963_v40  ;;  %v2062_v40 = vpack.c.bf16 %v1222_v38, %v1220_v36  ;;  %v1249_v36 = vld [vmem:[#allocation12 + $0x1f0] sm:$0xff] }
 0x430   :  { %2031 = vmatprep.subr.bf16.mxu0 %v2030_v54  ;;  %v1232_v54 = vld [vmem:[#allocation12 + $0x168] sm:$0xff]  ;;  %v2092_v38 = vpack.c.bf16 %v1249_v36, %v1247_v35  ;;  %v1387_v36 = vld [vmem:[#allocation13 + $0x158] sm:$0xff] }
 0x431   :  { %v1385_v35 = vld [vmem:[#allocation13 + $0x148] sm:$0xff] }
 0x432   :  { %1633 = vmatmul.mubr.msk.f32.vlgmr.msra.gmra.mrb[8].mxu0 %vm204_vm3, %v2208_v41  ;;  %v1219_v41 = vld [vmem:[#allocation12 + $0x100] sm:$0xff] }
 0x433   :  { %1003 = vmatprep.mubr.f32.mxu0 %v2408_v0  ;;  %v1189_v0 = vld [vmem:[#allocation12 + $0x10] sm:$0xff] }
 0x434   :  { %v2032_v57 = vpack.c.bf16 %v1189_v0, %v1187_v53  ;;  %v1229_v53 = vld [vmem:[#allocation12 + $0x150] sm:$0xff]  ;;  %v1234_v0 = vld [vmem:[#allocation12 + $0x178] sm:$0xff] }
 0x435   :  { %v2072_v55 = vpack.c.bf16 %v1229_v53, %v1227_v52  ;;  %v2074_v56 = vpack.c.bf16 %v1234_v0, %v1232_v54  ;;  %v1352_v53 = vld [vmem:[#allocation13 + $0x40] sm:$0xff]  ;;  %v1354_v54 = vld [vmem:[#allocation13 + $0x50] sm:$0xff]  ;;  %v1357_v0 = vld [vmem:[#allocation13 + $0x68] sm:$0xff] }
 0x436   :  { %1634 = vmatmul.mubr.msk.f32.gmra.mrb[10].mxu0 %vm204_vm3, %v2209_v42  ;;  %v1221_v42 = vld [vmem:[#allocation12 + $0x110] sm:$0xff] }
 0x437   :  { %2033 = vmatpush1.bf16.msra.mxu0 %v2032_v57  ;;  %v2064_v45 = vpack.c.bf16 %v1221_v42, %v1219_v41  ;;  %v1231_v57 = vld [vmem:[#allocation12 + $0x160] sm:$0xff] }
 0x438   :  { %2035 = vmatprep.subr.bf16.mxu0 %v2034_v58  ;;  %v1233_v58 = vld [vmem:[#allocation12 + $0x170] sm:$0xff]  ;;  %v1344_v41 = vld [vmem:[#allocation13] sm:$0xff] }
 0x439   :  { %v2076_v61 = vpack.c.bf16 %v1233_v58, %v1231_v57  ;;  %v1356_v58 = vld [vmem:[#allocation13 + $0x60] sm:$0xff] }
 0x43b   :  { %2037 = vmatpush1.bf16.msra.mxu0 %v2036_v63  ;;  %v1235_v63 = vld [vmem:[#allocation12 + $0x180] sm:$0xff] }
 0x43c   :  { %2039 = vmatprep.subr.bf16.mxu0 %v2038_v1  ;;  %v1237_v1 = vld [vmem:[#allocation12 + $0x190] sm:$0xff] }
 0x43d   :  { %v2080_v4 = vpack.c.bf16 %v1237_v1, %v1235_v63  ;;  %v1360_v1 = vld [vmem:[#allocation13 + $0x80] sm:$0xff] }
 0x43f   :  { %2041 = vmatpush1.bf16.msra.mxu0 %v2040_v6  ;;  %v1239_v6 = vld [vmem:[#allocation12 + $0x1a0] sm:$0xff] }
 0x440   :  { %2043 = vmatprep.subr.bf16.mxu0 %v2042_v7  ;;  %v1241_v7 = vld [vmem:[#allocation12 + $0x1b0] sm:$0xff] }
 0x441   :  { %v2084_v10 = vpack.c.bf16 %v1241_v7, %v1239_v6  ;;  %v1364_v7 = vld [vmem:[#allocation13 + $0xa0] sm:$0xff] }
 0x443   :  { %2045 = vmatpush1.bf16.msra.mxu0 %v2044_v12  ;;  %v1010_v12 = vld [vmem:[%s2923_s11] sm:$0x3] }
 0x444   :  { %2047 = vmatprep.subr.bf16.mxu0 %v2046_v13  ;;  %v1015_v13 = vrot.slane %v1010_v12, %v2707_v26  ;;  %v1019_v14 = vrot.slane %v1010_v12, %v2712_v28 }
 0x447   :  { %2049 = vmatpush1.bf16.msra.mxu0 %v2048_v18 }
 0x448   :  { %2051 = vmatprep.subr.bf16.mxu0 %v2050_v19 }
 0x44b   :  { %2053 = vmatpush1.bf16.msra.mxu0 %v2052_v24 }
 0x44c   :  { %2055 = vmatprep.subr.bf16.mxu0 %v2054_v25 }
 0x44f   :  { %2057 = vmatpush1.bf16.msra.mxu0 %v2056_v32  ;;  %v1248_v32 = vld [vmem:[#allocation12 + $0x1e8] sm:$0xff] }
 0x450   :  { %2059 = vmatprep.subr.bf16.mxu0 %v2058_v33  ;;  %v1250_v33 = vld [vmem:[#allocation12 + $0x1f8] sm:$0xff] }
 0x451   :  { %v2090_v34 = vpack.c.bf16 %v1250_v33, %v1248_v32  ;;  %v2130_v32 = vpack.c.bf16 %v1383_v30, %v1381_v29  ;;  %v1380_v33 = vld [vmem:[#allocation13 + $0x120] sm:$0xff]  ;;  %v1502_v29 = vld [vmem:[%s2930_s18 + $0x8] sm:$0xff] }
 0x452   :  { %v1519_v30 = vld [vmem:[%s2930_s18 + $0x90] sm:$0xff] }
 0x453   :  { %2061 = vmatpush1.bf16.msra.mxu0 %v2060_v39  ;;  %v1345_v39 = vld [vmem:[#allocation13 + $0x8] sm:$0xff] }
 0x454   :  { %2063 = vmatprep.subr.bf16.mxu0 %v2062_v40  ;;  %v1347_v40 = vld [vmem:[#allocation13 + $0x18] sm:$0xff] }
 0x455   :  { %v2094_v42 = vpack.c.bf16 %v1347_v40, %v1345_v39  ;;  %v2134_v39 = vpack.c.bf16 %v1387_v36, %v1385_v35  ;;  %v1384_v40 = vld [vmem:[#allocation13 + $0x140] sm:$0xff]  ;;  %v1504_v35 = vld [vmem:[%s2930_s18 + $0x18] sm:$0xff]  ;;  %v1521_v36 = vld [vmem:[%s2930_s18 + $0xa0] sm:$0xff] }
 0x457   :  { %2065 = vmatpush1.bf16.msra.mxu0 %v2064_v45  ;;  %v1351_v45 = vld [vmem:[#allocation13 + $0x38] sm:$0xff]  ;;  %2095 = vmatprep.subr.bf16.mxu1 %v2094_v42  ;;  %v1389_v42 = vld [vmem:[#allocation13 + $0x168] sm:$0xff] }
 0x458   :  { %2067 = vmatprep.subr.bf16.mxu0 %v2066_v46  ;;  %v2096_v46 = vpack.c.bf16 %v1346_v43, %v1344_v41  ;;  %v2098_v47 = vpack.c.bf16 %v1351_v45, %v1349_v44  ;;  %v1386_v41 = vld [vmem:[#allocation13 + $0x150] sm:$0xff]  ;;  %v1391_v43 = vld [vmem:[#allocation13 + $0x178] sm:$0xff] }
 0x459   :  { %v2136_v44 = vpack.c.bf16 %v1386_v41, %v1384_v40  ;;  %v2138_v45 = vpack.c.bf16 %v1391_v43, %v1389_v42  ;;  %v1505_v41 = vld [vmem:[%s2930_s18 + $0x20] sm:$0xff]  ;;  %v1506_v42 = vld [vmem:[%s2930_s18 + $0x28] sm:$0xff]  ;;  %v1523_v43 = vld [vmem:[%s2930_s18 + $0xb0] sm:$0xff] }
 0x45b   :  { %2069 = vmatpush1.bf16.msra.mxu0 %v2068_v51  ;;  %v1355_v51 = vld [vmem:[#allocation13 + $0x58] sm:$0xff] }
 0x45c   :  { %2071 = vmatprep.subr.bf16.mxu0 %v2070_v37  ;;  %v2100_v37 = vpack.c.bf16 %v1350_v49, %v1348_v48  ;;  %v2102_v52 = vpack.c.bf16 %v1355_v51, %v1353_v50  ;;  %v1393_v48 = vld [vmem:[#allocation13 + $0x188] sm:$0xff]  ;;  %v1395_v49 = vld [vmem:[#allocation13 + $0x198] sm:$0xff] }
 0x45d   :  { %v2142_v51 = vpack.c.bf16 %v1395_v49, %v1393_v48  ;;  %v1508_v48 = vld [vmem:[%s2930_s18 + $0x38] sm:$0xff]  ;;  %v1525_v49 = vld [vmem:[%s2930_s18 + $0xc0] sm:$0xff] }
 0x45f   :  { %2073 = vmatpush1.bf16.msra.mxu0 %v2072_v55  ;;  %v1359_v55 = vld [vmem:[#allocation13 + $0x78] sm:$0xff] }
 0x460   :  { %2075 = vmatprep.subr.bf16.mxu0 %v2074_v56  ;;  %v2104_v56 = vpack.c.bf16 %v1354_v54, %v1352_v53  ;;  %v2106_v57 = vpack.c.bf16 %v1359_v55, %v1357_v0  ;;  %v1397_v53 = vld [vmem:[#allocation13 + $0x1a8] sm:$0xff]  ;;  %v1399_v54 = vld [vmem:[#allocation13 + $0x1b8] sm:$0xff] }
 0x461   :  { %v2146_v55 = vpack.c.bf16 %v1399_v54, %v1397_v53  ;;  %v1510_v53 = vld [vmem:[%s2930_s18 + $0x48] sm:$0xff]  ;;  %v1527_v54 = vld [vmem:[%s2930_s18 + $0xd0] sm:$0xff] }
 0x463   :  { %2077 = vmatpush1.bf16.msra.mxu0 %v2076_v61  ;;  %v1363_v61 = vld [vmem:[#allocation13 + $0x98] sm:$0xff] }
 0x464   :  { %2079 = vmatprep.subr.bf16.mxu0 %v2078_v62  ;;  %v2108_v62 = vpack.c.bf16 %v1358_v59, %v1356_v58  ;;  %v2110_v63 = vpack.c.bf16 %v1363_v61, %v1361_v60  ;;  %v1401_v58 = vld [vmem:[#allocation13 + $0x1c8] sm:$0xff]  ;;  %v1403_v59 = vld [vmem:[#allocation13 + $0x1d8] sm:$0xff] }
 0x465   :  { %v2150_v61 = vpack.c.bf16 %v1403_v59, %v1401_v58  ;;  %v1512_v58 = vld [vmem:[%s2930_s18 + $0x58] sm:$0xff]  ;;  %v1529_v59 = vld [vmem:[%s2930_s18 + $0xe0] sm:$0xff] }
 0x467   :  { %2081 = vmatpush1.bf16.msra.mxu0 %v2080_v4  ;;  %v1367_v4 = vld [vmem:[#allocation13 + $0xb8] sm:$0xff] }
 0x468   :  { %2083 = vmatprep.subr.bf16.mxu0 %v2082_v5  ;;  %v2112_v5 = vpack.c.bf16 %v1362_v2, %v1360_v1  ;;  %v2114_v6 = vpack.c.bf16 %v1367_v4, %v1365_v3 }
 0x46b   :  { %2085 = vmatpush1.bf16.msra.mxu0 %v2084_v10  ;;  %v1371_v10 = vld [vmem:[#allocation13 + $0xd8] sm:$0xff] }
 0x46c   :  { %2087 = vmatprep.subr.bf16.mxu0 %v2086_v11  ;;  %v2116_v11 = vpack.c.bf16 %v1366_v8, %v1364_v7  ;;  %v2118_v12 = vpack.c.bf16 %v1371_v10, %v1369_v9 }
 0x46f   :  { %2089 = vmatpush1.bf16.msra.mxu0 %v2088_v31 }
 0x470   :  { %2091 = vmatprep.subr.bf16.mxu0 %v2090_v34  ;;  %v1382_v34 = vld [vmem:[#allocation13 + $0x130] sm:$0xff] }
 0x473   :  { %2093 = vmatpush1.bf16.msra.mxu0 %v2092_v38  ;;  %v2132_v38 = vpack.c.bf16 %v1382_v34, %v1380_v33  ;;  %v1503_v34 = vld [vmem:[%s2930_s18 + $0x10] sm:$0xff] }
 0x505   :  { %v999_v15 = vpop.f32.mrb[8].mxu0 }
 0x506   :  { %v1022_v16 = vadd.f32 %v1015_v13, %v999_v15  ;;  %v1001_v17 = vpop.f32.mrb[9].mxu0  ;;  %v1373_v15 = vld [vmem:[#allocation13 + $0xe8] sm:$0xff] }
 0x507   :  { %v1023_v18 = vadd.f32 %v1019_v14, %v1001_v17 }
 0x508   :  { %v1026_v21 = vmax.f32 %v1022_v16, 0.0  ;;  %v1375_v16 = vld [vmem:[#allocation13 + $0xf8] sm:$0xff] }
 0x509   :  { %v1027_v19 = vmax.f32 %v1023_v18, 0.0  ;;  %v1005_v20 = vpop.f32.mrb[10].mxu0  ;;  %v2122_v18 = vpack.c.bf16 %v1375_v16, %v1373_v15  ;;  %v1402_v15 = vld [vmem:[#allocation13 + $0x1d0] sm:$0xff] }
 0x50a   :  { %v1024_v22 = vadd.f32 %v1015_v13, %v1005_v20  ;;  %v1007_v23 = vpop.f32.mrb[11].mxu0  ;;  %v1368_v13 = vld [vmem:[#allocation13 + $0xc0] sm:$0xff]  ;;  %v1374_v20 = vld [vmem:[#allocation13 + $0xf0] sm:$0xff] }
 0x50b   :  { %v1025_v24 = vadd.f32 %v1019_v14, %v1007_v23  ;;  %1170 = vmatprep.mubr.f32.mxu1 %v1027_v19  ;;  %v1370_v14 = vld [vmem:[#allocation13 + $0xd0] sm:$0xff]  ;;  %v1372_v19 = vld [vmem:[#allocation13 + $0xe0] sm:$0xff] }
 0x50c   :  { %1171 = vmatmul.mubr.f32.vlgmr.msra.gmra.mrb[8].mxu1 %v1026_v21  ;;  %v1028_v27 = vmax.f32 %v1024_v22, 0.0  ;;  %v2120_v17 = vpack.c.bf16 %v1370_v14, %v1368_v13  ;;  %v1377_v21 = vld [vmem:[#allocation13 + $0x108] sm:$0xff]  ;;  %v1379_v22 = vld [vmem:[#allocation13 + $0x118] sm:$0xff]  ;;  %v2124_v23 = vpack.c.bf16 %v1374_v20, %v1372_v19  ;;  %v1400_v14 = vld [vmem:[#allocation13 + $0x1c0] sm:$0xff] }
 0x50d   :  { %v1029_v25 = vmax.f32 %v1025_v24, 0.0  ;;  %2097 = vmatpush1.bf16.msra.mxu1 %v2096_v46  ;;  %v2126_v24 = vpack.c.bf16 %v1379_v22, %v1377_v21  ;;  %v1388_v46 = vld [vmem:[#allocation13 + $0x160] sm:$0xff]  ;;  %v2152_v16 = vpack.c.bf16 %v1402_v15, %v1400_v14  ;;  %v1406_v21 = vld [vmem:[#allocation13 + $0x1f0] sm:$0xff] }
 0x50e   :  { %2099 = vmatprep.subr.bf16.mxu1 %v2098_v47  ;;  %v1390_v47 = vld [vmem:[#allocation13 + $0x170] sm:$0xff]  ;;  %v1404_v20 = vld [vmem:[#allocation13 + $0x1e0] sm:$0xff] }
 0x50f   :  { %1176 = vmatprep.mubr.f32.mxu1 %v1029_v25  ;;  %v1376_v25 = vld [vmem:[#allocation13 + $0x100] sm:$0xff]  ;;  %v2140_v50 = vpack.c.bf16 %v1390_v47, %v1388_v46  ;;  %v2156_v22 = vpack.c.bf16 %v1406_v21, %v1404_v20  ;;  %v1513_v15 = vld [vmem:[%s2930_s18 + $0x60] sm:$0xff] }
 0x510   :  { %1177 = vmatmul.mubr.f32.gmra.mrb[10].mxu1 %v1028_v27  ;;  %v1378_v27 = vld [vmem:[#allocation13 + $0x110] sm:$0xff]  ;;  %v1507_v47 = vld [vmem:[%s2930_s18 + $0x30] sm:$0xff] }
 0x511   :  { %2101 = vmatpush1.bf16.msra.mxu1 %v2100_v37  ;;  %v2128_v31 = vpack.c.bf16 %v1378_v27, %v1376_v25  ;;  %v1392_v37 = vld [vmem:[#allocation13 + $0x180] sm:$0xff]  ;;  %v1501_v25 = vld [vmem:[%s2930_s18] sm:$0xff] }
 0x512   :  { %2103 = vmatprep.subr.bf16.mxu1 %v2102_v52  ;;  %v1394_v52 = vld [vmem:[#allocation13 + $0x190] sm:$0xff]  ;;  %v1515_v21 = vld [vmem:[%s2930_s18 + $0x70] sm:$0xff] }
 0x513   :  { %v2144_v0 = vpack.c.bf16 %v1394_v52, %v1392_v37  ;;  %v1509_v52 = vld [vmem:[%s2930_s18 + $0x40] sm:$0xff] }
 0x515   :  { %2105 = vmatpush1.bf16.msra.mxu1 %v2104_v56  ;;  %v1396_v56 = vld [vmem:[#allocation13 + $0x1a0] sm:$0xff] }
 0x516   :  { %2107 = vmatprep.subr.bf16.mxu1 %v2106_v57  ;;  %v1398_v57 = vld [vmem:[#allocation13 + $0x1b0] sm:$0xff] }
 0x517   :  { %v2148_v60 = vpack.c.bf16 %v1398_v57, %v1396_v56  ;;  %v1511_v57 = vld [vmem:[%s2930_s18 + $0x50] sm:$0xff] }
 0x519   :  { %2109 = vmatpush1.bf16.msra.mxu1 %v2108_v62  ;;  %v1094_v62 = vld [vmem:[%s2925_s13] sm:$0x3] }
 0x51a   :  { %2111 = vmatprep.subr.bf16.mxu1 %v2110_v63  ;;  %v1099_v63 = vrot.slane %v1094_v62, %v2707_v26  ;;  %v1103_v1 = vrot.slane %v1094_v62, %v2712_v28 }
 0x51d   :  { %2113 = vmatpush1.bf16.msra.mxu1 %v2112_v5 }
 0x51e   :  { %2115 = vmatprep.subr.bf16.mxu1 %v2114_v6 }
 0x521   :  { %2117 = vmatpush1.bf16.msra.mxu1 %v2116_v11 }
 0x522   :  { %2119 = vmatprep.subr.bf16.mxu1 %v2118_v12 }
 0x525   :  { %2121 = vmatpush1.bf16.msra.mxu1 %v2120_v17  ;;  %v1405_v17 = vld [vmem:[#allocation13 + $0x1e8] sm:$0xff] }
 0x526   :  { %2123 = vmatprep.subr.bf16.mxu1 %v2122_v18  ;;  %v1407_v18 = vld [vmem:[#allocation13 + $0x1f8] sm:$0xff] }
 0x527   :  { %v2154_v19 = vpack.c.bf16 %v1407_v18, %v1405_v17  ;;  %v1531_v18 = vld [vmem:[%s2930_s18 + $0xf0] sm:$0xff] }
 0x529   :  { %2125 = vmatpush1.bf16.msra.mxu1 %v2124_v23  ;;  %v1517_v23 = vld [vmem:[%s2930_s18 + $0x80] sm:$0xff] }
 0x52a   :  { %2127 = vmatprep.subr.bf16.mxu1 %v2126_v24  ;;  %v1518_v24 = vld [vmem:[%s2930_s18 + $0x88] sm:$0xff] }
 0x52b   :  { %v2158_v27 = vpack.c.bf16 %v1518_v24, %v1517_v23  ;;  %v1408_v24 = vld [vmem:[%s2929_s17] sm:$0x3] }
 0x52d   :  { %2129 = vmatpush1.bf16.msra.mxu1 %v2128_v31  ;;  %v1520_v31 = vld [vmem:[%s2930_s18 + $0x98] sm:$0xff]  ;;  %2159 = vmatprep.subr.bf16.mxu0 %v2158_v27  ;;  %v1417_v27 = vrot.slane %v1408_v24, %v2712_v28 }
 0x52e   :  { %2131 = vmatprep.subr.bf16.mxu1 %v2130_v32  ;;  %v2160_v32 = vpack.c.bf16 %v1502_v29, %v1501_v25  ;;  %v2162_v33 = vpack.c.bf16 %v1520_v31, %v1519_v30  ;;  %v1413_v25 = vrot.slane %v1408_v24, %v2707_v26 }
 0x531   :  { %2133 = vmatpush1.bf16.msra.mxu1 %v2132_v38  ;;  %v1522_v38 = vld [vmem:[%s2930_s18 + $0xa8] sm:$0xff] }
 0x532   :  { %2135 = vmatprep.subr.bf16.mxu1 %v2134_v39  ;;  %v2164_v39 = vpack.c.bf16 %v1504_v35, %v1503_v34  ;;  %v2166_v40 = vpack.c.bf16 %v1522_v38, %v1521_v36 }
 0x535   :  { %2137 = vmatpush1.bf16.msra.mxu1 %v2136_v44  ;;  %v1524_v44 = vld [vmem:[%s2930_s18 + $0xb8] sm:$0xff] }
 0x536   :  { %2139 = vmatprep.subr.bf16.mxu1 %v2138_v45  ;;  %v2168_v45 = vpack.c.bf16 %v1506_v42, %v1505_v41  ;;  %v2170_v46 = vpack.c.bf16 %v1524_v44, %v1523_v43 }
 0x539   :  { %2141 = vmatpush1.bf16.msra.mxu1 %v2140_v50  ;;  %v1526_v50 = vld [vmem:[%s2930_s18 + $0xc8] sm:$0xff] }
 0x53a   :  { %2143 = vmatprep.subr.bf16.mxu1 %v2142_v51  ;;  %v2172_v51 = vpack.c.bf16 %v1508_v48, %v1507_v47  ;;  %v2174_v37 = vpack.c.bf16 %v1526_v50, %v1525_v49 }
 0x53d   :  { %2145 = vmatpush1.bf16.msra.mxu1 %v2144_v0  ;;  %v1528_v0 = vld [vmem:[%s2930_s18 + $0xd8] sm:$0xff] }
 0x53e   :  { %2147 = vmatprep.subr.bf16.mxu1 %v2146_v55  ;;  %v2176_v55 = vpack.c.bf16 %v1510_v53, %v1509_v52  ;;  %v2178_v56 = vpack.c.bf16 %v1528_v0, %v1527_v54 }
 0x541   :  { %2149 = vmatpush1.bf16.msra.mxu1 %v2148_v60  ;;  %v1530_v60 = vld [vmem:[%s2930_s18 + $0xe8] sm:$0xff] }
 0x542   :  { %2151 = vmatprep.subr.bf16.mxu1 %v2150_v61  ;;  %v2180_v61 = vpack.c.bf16 %v1512_v58, %v1511_v57  ;;  %v2182_v62 = vpack.c.bf16 %v1530_v60, %v1529_v59 }
 0x545   :  { %2153 = vmatpush1.bf16.msra.mxu1 %v2152_v16  ;;  %v1514_v16 = vld [vmem:[%s2930_s18 + $0x68] sm:$0xff] }
 0x546   :  { %2155 = vmatprep.subr.bf16.mxu1 %v2154_v19  ;;  %v2184_v17 = vpack.c.bf16 %v1514_v16, %v1513_v15  ;;  %v1532_v19 = vld [vmem:[%s2930_s18 + $0xf8] sm:$0xff] }
 0x547   :  { %v2186_v20 = vpack.c.bf16 %v1532_v19, %v1531_v18 }
 0x549   :  { %2157 = vmatpush1.bf16.msra.mxu1 %v2156_v22  ;;  %v1516_v22 = vld [vmem:[%s2930_s18 + $0x78] sm:$0xff] }
 0x54a   :  { %v2188_v23 = vpack.c.bf16 %v1516_v22, %v1515_v21 }
 0x5df   :  { %v1172_v2 = vpop.f32.mrb[8].mxu1 }
 0x5e0   :  { %v1173_v3 = vadd.f32 %v1172_v2, %v1099_v63  ;;  %v1174_v4 = vpop.f32.mrb[9].mxu1 }
 0x5e1   :  { %v1175_v5 = vadd.f32 %v1174_v4, %v1103_v1 }
 0x5e2   :  { %v1183_v8 = vmax.f32 %v1173_v3, 0.0 }
 0x5e3   :  { %v1184_v6 = vmax.f32 %v1175_v5, 0.0  ;;  %v1178_v7 = vpop.f32.mrb[10].mxu1 }
 0x5e4   :  { %v1179_v9 = vadd.f32 %v1178_v7, %v1099_v63  ;;  %v1180_v10 = vpop.f32.mrb[11].mxu1  ;;  %v1251_v63 = vld [vmem:[%s2927_s15] sm:$0x3] }
 0x5e5   :  { %v1181_v11 = vadd.f32 %v1180_v10, %v1103_v1  ;;  %1327 = vmatprep.mubr.f32.mxu0 %v1184_v6  ;;  %v1256_v1 = vrot.slane %v1251_v63, %v2707_v26  ;;  %v1260_v2 = vrot.slane %v1251_v63, %v2712_v28  ;;  %v1635_v26 = vld [vmem:[%s2951_s21] ss:$0 sm:$0xff] }
 0x5e6   :  { %1328 = vmatmul.mubr.f32.vlgmr.msra.gmra.mrb[12].mxu0 %v1183_v8  ;;  %v1185_v13 = vmax.f32 %v1179_v9, 0.0 }
 0x5e7   :  { %v1186_v12 = vmax.f32 %v1181_v11, 0.0  ;;  %2161 = vmatpush3.bf16.msra.mxu0 %v2160_v32 }
 0x5e8   :  { %2163 = vmatprep.subr.bf16.mxu0 %v2162_v33 }
 0x5e9   :  { %1333 = vmatprep.mubr.f32.mxu0 %v1186_v12 }
 0x5ea   :  { %1334 = vmatmul.mubr.f32.gmra.mrb[14].mxu0 %v1185_v13 }
 0x5eb   :  { %2165 = vmatpush3.bf16.msra.mxu0 %v2164_v39 }
 0x5ec   :  { %2167 = vmatprep.subr.bf16.mxu0 %v2166_v40 }
 0x5ef   :  { %2169 = vmatpush3.bf16.msra.mxu0 %v2168_v45 }
 0x5f0   :  { %2171 = vmatprep.subr.bf16.mxu0 %v2170_v46 }
 0x5f3   :  { %2173 = vmatpush3.bf16.msra.mxu0 %v2172_v51 }
 0x5f4   :  { %2175 = vmatprep.subr.bf16.mxu0 %v2174_v37 }
 0x5f7   :  { %2177 = vmatpush3.bf16.msra.mxu0 %v2176_v55 }
 0x5f8   :  { %2179 = vmatprep.subr.bf16.mxu0 %v2178_v56 }
 0x5fb   :  { %2181 = vmatpush3.bf16.msra.mxu0 %v2180_v61 }
 0x5fc   :  { %2183 = vmatprep.subr.bf16.mxu0 %v2182_v62 }
 0x5ff   :  { %2185 = vmatpush3.bf16.msra.mxu0 %v2184_v17 }
 0x600   :  { %2187 = vmatprep.subr.bf16.mxu0 %v2186_v20 }
 0x603   :  { %2189 = vmatpush3.bf16.msra.mxu0 %v2188_v23 }
 0x6b9   :  { %v1329_v3 = vpop.f32.mrb[12].mxu0 }
 0x6ba   :  { %v1330_v4 = vadd.f32 %v1329_v3, %v1256_v1  ;;  %v1331_v5 = vpop.f32.mrb[13].mxu0 }
 0x6bb   :  { %v1332_v6 = vadd.f32 %v1331_v5, %v1260_v2 }
 0x6bc   :  { %v1340_v9 = vmax.f32 %v1330_v4, 0.0 }
 0x6bd   :  { %v1341_v7 = vmax.f32 %v1332_v6, 0.0  ;;  %v1335_v8 = vpop.f32.mrb[14].mxu0 }
 0x6be   :  { %v1336_v10 = vadd.f32 %v1335_v8, %v1256_v1  ;;  %v1337_v11 = vpop.f32.mrb[15].mxu0 }
 0x6bf   :  { %v1338_v12 = vadd.f32 %v1337_v11, %v1260_v2  ;;  %1484 = vmatprep.mubr.f32.mxu1 %v1341_v7 }
 0x6c0   :  { %1485 = vmatmul.mubr.f32.vlgmr.msra.gmra.mrb[12].mxu1 %v1340_v9  ;;  %v1342_v14 = vmax.f32 %v1336_v10, 0.0 }
 0x6c1   :  { %v1343_v13 = vmax.f32 %v1338_v12, 0.0 }
 0x6c3   :  { %1490 = vmatprep.mubr.f32.mxu1 %v1343_v13 }
 0x6c4   :  { %1491 = vmatmul.mubr.f32.gmra.mrb[14].mxu1 %v1342_v14 }
 0x793   :  { %v1486_v29 = vpop.f32.mrb[12].mxu1 }
 0x794   :  { %v1487_v30 = vadd.f32 %v1486_v29, %v1413_v25  ;;  %v1488_v31 = vpop.f32.mrb[13].mxu1 }
 0x795   :  { %v1489_v32 = vadd.f32 %v1488_v31, %v1417_v27 }
 0x796   :  { %v1497_v35 = vmax.f32 %v1487_v30, 0.0 }
 0x797   :  { %v1498_v33 = vmax.f32 %v1489_v32, 0.0  ;;  %v1492_v34 = vpop.f32.mrb[14].mxu1 }
 0x798   :  { %v1493_v36 = vadd.f32 %v1492_v34, %v1413_v25  ;;  %v1494_v38 = vpop.f32.mrb[15].mxu1 }
 0x799   :  { %v1495_v39 = vadd.f32 %v1494_v38, %v1417_v27  ;;  %1604 = vmatprep.mubr.f32.mxu0 %v1498_v33 }
 0x79a   :  { %1605 = vmatmul.mubr.f32.vlgmr.msra.gmra.mrb[16].mxu0 %v1497_v35  ;;  %v1499_v41 = vmax.f32 %v1493_v36, 0.0 }
 0x79b   :  { %v1500_v40 = vmax.f32 %v1495_v39, 0.0 }
 0x79d   :  { %1609 = vmatprep.mubr.f32.mxu0 %v1500_v40 }
 0x79e   :  { %1610 = vmatmul.mubr.f32.gmra.mrb[18].mxu0 %v1499_v41 }
 0x86d   :  { %v1668_v42 = vpop.f32.mrb[16].mxu0 }
 0x86e   :  { %v1669_v28 = vpop.f32.mrb[17].mxu0 }
 0x86f   :  { %v1670_v43 = vadd.f32 %v1669_v28, %v1668_v42 }
 0x871   :  { %v1607_v44 = vadd.f32 %v1670_v43, %v1635_v26  ;;  %v1671_v45 = vpop.f32.mrb[18].mxu0 }
 0x872   :  { %v1672_v46 = vpop.f32.mrb[19].mxu0 }
 0x873   :  { %1616 = vst.msk [vmem:[%s2952_s23] sm:$0xff] %vm1615_vm4, %v1607_v44  ;;  %v1673_v47 = vadd.f32 %v1672_v46, %v1671_v45 }
 0x875   :  { %v1612_v48 = vadd.f32 %v1673_v47, %v1635_v26 }
 0x877   :  { %1617 = vst.msk [vmem:[%s2952_s23 + $0x8] sm:$0xff] %vm1615_vm4, %v1612_v48 }
 0x878   :  { %1622 = vsyncpa [#allocation3], 1 }
 0x879   :  { %1623 = vsyncpa [#allocation5], 1 }
 0x87a   :  { %1624 = vsyncpa [#allocation8], 1 }
 0x87b   :  { %1625 = vsyncpa [#allocation11], 1 }
 0x87c   :  { %1626 = vsyncpa [#allocation14], 1 }

</bundles_post_ra>
